<compile_context>
chip_gen: v5e
topology: v5e:2x2
jax: 0.10.0
libtpu: 0.0.40
codegen_flags: <defaults>
</compile_context>

<pallas_src>
from functools import partial

import jax
import jax.numpy as jnp
from jax.experimental import pallas as pl
from jax.experimental.pallas import tpu as pltpu

# ----------------------- model hyper-parameters (small) ----------------------
EMBED_DIM = 32     # stand-in for 768
NUM_HEADS = 4      # stand-in for 12
DEPTH = 2          # stand-in for 12
MLP_DIM = 64       # stand-in for 3072
BATCH = 2
SEQ = 8
HEAD_DIM = EMBED_DIM // NUM_HEADS
LN_EPS = 1e-5
WEIGHT_DTYPE = jnp.bfloat16    # MXU-native matmul inputs; elementwise math stays f32


# ------------------------------ Pallas kernel --------------------------------
def _layernorm(x, w, b):
    # PyTorch LayerNorm: biased variance over last axis, f32 math.
    mean = jnp.mean(x, axis=-1, keepdims=True)
    var = jnp.mean((x - mean) ** 2, axis=-1, keepdims=True)
    return (x - mean) * jax.lax.rsqrt(var + LN_EPS) * w + b


def _make_encoder_kernel(batch_tile, seq, embed, heads):
    hd = embed // heads
    rows = batch_tile * seq
    wd = WEIGHT_DTYPE

    def kernel(x_ref,                         # (R, E) f32 input block
               wqkv_ref, bqkv_ref,            # (1, E, 3E) bf16 / (1, 1, 3E) f32
               wo_ref, bo_ref,                # (1, H, hd, E) bf16 / (1, 1, E) f32
               ln1w_ref, ln1b_ref,            # (1, 1, E)
               w1_ref, b1_ref,                # (1, E, MLP) bf16 / (1, 1, MLP)
               w2_ref, b2_ref,                # (1, MLP, E) bf16 / (1, 1, E)
               ln2w_ref, ln2b_ref,            # (1, 1, E)
               o_ref):                        # (R, E) f32 — VMEM-resident across layers
        layer = pl.program_id(1)

        # At the first layer of this row block, seed the resident activation from x.
        @pl.when(layer == 0)
        def _():
            o_ref[...] = x_ref[...].astype(o_ref.dtype)

        x = o_ref[...].astype(jnp.float32)                          # (R, E)

        # ---- fused lane-dense QKV projection (single weight copy, bf16 MXU) ----
        # 1/sqrt(head_dim) is host-folded into the q columns of wqkv / bqkv.
        qkv = jnp.dot(x.astype(wd), wqkv_ref[0],
                      preferred_element_type=jnp.float32) + bqkv_ref[0]   # (R, 3E) f32

        wo = wo_ref[0]                                              # (H, hd, E) bf16
        attn = jnp.zeros((rows, embed), jnp.float32)
        for h in range(heads):                                      # static, small
            q_h = qkv[:, h * hd:(h + 1) * hd]
            k_h = qkv[:, embed + h * hd: embed + (h + 1) * hd]
            v_h = qkv[:, 2 * embed + h * hd: 2 * embed + (h + 1) * hd]
            # bf16 after the bias add (already included in qkv); f32 accumulation.
            q_h = q_h.reshape(batch_tile, seq, hd).astype(wd)
            k_h = k_h.reshape(batch_tile, seq, hd).astype(wd)
            v_h = v_h.reshape(batch_tile, seq, hd).astype(wd)

            s = jnp.einsum('bqd,bkd->bqk', q_h, k_h,
                           preferred_element_type=jnp.float32)      # (bt, S, S)
            s = s - jnp.max(s, axis=-1, keepdims=True)
            p = jnp.exp(s)
            p = p * pl.reciprocal(jnp.sum(p, axis=-1, keepdims=True), approx=False)

            ctx = jnp.einsum('bqk,bkd->bqd', p.astype(wd), v_h,
                             preferred_element_type=jnp.float32)    # (bt, S, hd)

            # Head merge: accumulate each head's output projection into one (R, E)
            # f32 buffer (no concat, no H x (R,E) intermediate).
            attn = attn + jnp.dot(ctx.reshape(rows, hd).astype(wd), wo[h],
                                  preferred_element_type=jnp.float32)
        attn = attn + bo_ref[0]

        x1 = _layernorm(x + attn, ln1w_ref[0], ln1b_ref[0])

        # ---- feed-forward block (lane-dense (R, *) bf16 matmuls) ----
        h1 = jnp.dot(x1.astype(wd), w1_ref[0],
                     preferred_element_type=jnp.float32) + b1_ref[0]
        h1 = jnp.maximum(h1, 0.0)
        ff = jnp.dot(h1.astype(wd), w2_ref[0],
                     preferred_element_type=jnp.float32) + b2_ref[0]

        x2 = _layernorm(x1 + ff, ln2w_ref[0], ln2b_ref[0])

        # Carry to the next layer; Pallas only flushes to HBM when the row block
        # changes (i.e. after the last layer of this block).
        o_ref[...] = x2.astype(o_ref.dtype)

    return kernel


def _vmem_limit_bytes():
    """Per-generation VMEM budget: ~3/4 of physical, capped at 100 MiB
    (≈96 MiB on v5e/v6e's 128 MiB, ≈48 MiB on v7x's 64 MiB)."""
    phys = 128 * 1024 * 1024
    try:
        phys = int(pltpu.get_tpu_info().vmem_capacity_bytes)
    except Exception:
        pass
    return int(min(100 * 1024 * 1024, phys * 3 // 4))


# ------------------------------- wrapper --------------------------------------
@partial(jax.jit, static_argnames=("batch_tile",))
def transformer_encoder(x, stacked_params, batch_tile=1):
    """x: (B, S, E) float32.  stacked_params: tuple of arrays with leading DEPTH axis."""
    B, S, E = x.shape
    depth = stacked_params[0].shape[0]
    assert B % batch_tile == 0
    nb = B // batch_tile
    rows_blk = batch_tile * S
    assert rows_blk % 8 == 0 or nb == 1, "row tile must be sublane-aligned"

    def w_spec(shape_wo_depth):
        nd = len(shape_wo_depth)
        return pl.BlockSpec((1,) + tuple(shape_wo_depth),
                            lambda rb, l, _nd=nd: (l,) + (0,) * _nd)

    in_specs = [pl.BlockSpec((rows_blk, E), lambda rb, l: (rb, 0))]
    in_specs += [w_spec(p.shape[1:]) for p in stacked_params]

    kernel = _make_encoder_kernel(batch_tile, S, E, NUM_HEADS)

    out = pl.pallas_call(
        kernel,
        out_shape=jax.ShapeDtypeStruct((B * S, E), x.dtype),
        grid_spec=pltpu.PrefetchScalarGridSpec(
            num_scalar_prefetch=0,
            grid=(nb, depth),                    # row blocks outer, layers inner
            in_specs=in_specs,
            out_specs=pl.BlockSpec((rows_blk, E), lambda rb, l: (rb, 0)),
        ),
        compiler_params=pltpu.CompilerParams(
            # Row blocks are independent (2 TCs on v7x); layers are sequential.
            dimension_semantics=("parallel", "arbitrary"),
            vmem_limit_bytes=_vmem_limit_bytes(),
        ),
    )(x.reshape(B * S, E), *stacked_params)
    return out.reshape(B, S, E)


# --------------------------- parameter construction --------------------------
def init_layer_params_torch(key):
    """Random parameters in PyTorch nn.TransformerEncoderLayer storage convention."""
    ks = jax.random.split(key, 6)
    s = 0.02
    E, M = EMBED_DIM, MLP_DIM
    in_proj_w = s * jax.random.normal(ks[0], (3 * E, E), jnp.float32)
    in_proj_b = s * jax.random.normal(ks[1], (3 * E,), jnp.float32)
    out_proj_w = s * jax.random.normal(ks[2], (E, E), jnp.float32)
    out_proj_b = jnp.zeros((E,), jnp.float32)
    ln1_w = jnp.ones((E,), jnp.float32)
    ln1_b = jnp.zeros((E,), jnp.float32)
    lin1_w = s * jax.random.normal(ks[3], (M, E), jnp.float32)
    lin1_b = s * jax.random.normal(ks[4], (M,), jnp.float32)
    lin2_w = s * jax.random.normal(ks[5], (E, M), jnp.float32)
    lin2_b = jnp.zeros((E,), jnp.float32)
    ln2_w = jnp.ones((E,), jnp.float32)
    ln2_b = jnp.zeros((E,), jnp.float32)
    return (in_proj_w, in_proj_b, out_proj_w, out_proj_b, ln1_w, ln1_b,
            lin1_w, lin1_b, lin2_w, lin2_b, ln2_w, ln2_b)


def pack_layer(torch_params):
    """Host-side repack (done once): pre-transpose to (in,out), fold 1/sqrt(head_dim)
    into the q projection, cast matmul weights to bf16, split Wo per head."""
    (in_w, in_b, out_w, out_b, ln1_w, ln1_b,
     l1_w, l1_b, l2_w, l2_b, ln2_w, ln2_b) = torch_params
    E, H, hd, M = EMBED_DIM, NUM_HEADS, HEAD_DIM, MLP_DIM
    scale = 1.0 / (hd ** 0.5)

    wqkv = in_w.T                              # (E, 3E): columns [0:E]=q, [E:2E]=k, rest=v
    wqkv = wqkv.at[:, :E].multiply(scale)      # fold 1/sqrt(hd) into q weights
    bqkv = in_b.at[:E].multiply(scale).reshape(1, 3 * E)
    wo = out_w.T.reshape(H, hd, E)             # per-head slice of out_proj.weight.T
    bo = out_b.reshape(1, E)
    w1 = l1_w.T                                # (E, MLP)
    b1 = l1_b.reshape(1, M)
    w2 = l2_w.T                                # (MLP, E)
    b2 = l2_b.reshape(1, E)

    wd = WEIGHT_DTYPE
    return (wqkv.astype(wd), bqkv,
            wo.astype(wd), bo,
            ln1_w.reshape(1, E), ln1_b.reshape(1, E),
            w1.astype(wd), b1, w2.astype(wd), b2,
            ln2_w.reshape(1, E), ln2_b.reshape(1, E))


def stack_layers(per_layer_packed):
    """List (length DEPTH) of packed tuples -> tuple of arrays with leading DEPTH axis."""
    return tuple(jnp.stack(ps, axis=0) for ps in zip(*per_layer_packed))


# ----------------------------- pure-JAX reference ----------------------------
def _reference_forward(x, torch_layers):
    H, hd = NUM_HEADS, HEAD_DIM

    def ln(v, w, b):
        m = jnp.mean(v, -1, keepdims=True)
        va = jnp.mean((v - m) ** 2, -1, keepdims=True)
        return (v - m) / jnp.sqrt(va + LN_EPS) * w + b

    for (in_w, in_b, out_w, out_b, ln1_w, ln1_b,
         l1_w, l1_b, l2_w, l2_b, ln2_w, ln2_b) in torch_layers:
        B, S, E = x.shape
        qkv = x @ in_w.T + in_b
        q, k, v = qkv[..., :E], qkv[..., E:2 * E], qkv[..., 2 * E:]
        split = lambda t: jnp.transpose(t.reshape(B, S, H, hd), (0, 2, 1, 3))
        q, k, v = split(q), split(k), split(v)
        s = jnp.einsum('bhqd,bhkd->bhqk', q, k) / jnp.sqrt(jnp.float32(hd))
        p = jax.nn.softmax(s, axis=-1)
        ctx = jnp.einsum('bhqk,bhkd->bhqd', p, v)
        ctx = jnp.transpose(ctx, (0, 2, 1, 3)).reshape(B, S, E)
        attn = ctx @ out_w.T + out_b
        x = ln(x + attn, ln1_w, ln1_b)
        ff = jnp.maximum(x @ l1_w.T + l1_b, 0.0) @ l2_w.T + l2_b
        x = ln(x + ff, ln2_w, ln2_b)
    return x


if __name__ == "__main__":
    key = jax.random.PRNGKey(0)
    k_x, k_p = jax.random.split(key)
    x = jax.random.normal(k_x, (BATCH, SEQ, EMBED_DIM), jnp.float32)

    layer_keys = jax.random.split(k_p, DEPTH)
    torch_layers = [init_layer_params_torch(k) for k in layer_keys]
    stacked = stack_layers([pack_layer(p) for p in torch_layers])

    out = transformer_encoder(x, stacked, batch_tile=1)
    out = jax.block_until_ready(out)

    assert out.shape == (BATCH, SEQ, EMBED_DIM)
    assert bool(jnp.all(jnp.isfinite(out)))

    # bf16 matmul inputs -> loosened tolerance vs. the f32 reference.
    ref = _reference_forward(x, torch_layers)
    err = float(jnp.max(jnp.abs(out - ref)))
    assert err < 5e-2, f"max |kernel - reference| = {err}"
    print("KERNEL_OK")
</pallas_src>

<mosaic_0001>
module attributes {stable_mosaic.version = 11 : i64} {
  func.func @kernel(%arg0: i32, %arg1: i32, %arg2: memref<8x32xf32, #tpu.memory_space<vmem>>, %arg3: memref<1x32x96xbf16, #tpu.memory_space<vmem>>, %arg4: memref<1x1x96xf32, #tpu.memory_space<vmem>>, %arg5: memref<1x4x8x32xbf16, #tpu.memory_space<vmem>>, %arg6: memref<1x1x32xf32, #tpu.memory_space<vmem>>, %arg7: memref<1x1x32xf32, #tpu.memory_space<vmem>>, %arg8: memref<1x1x32xf32, #tpu.memory_space<vmem>>, %arg9: memref<1x32x64xbf16, #tpu.memory_space<vmem>>, %arg10: memref<1x1x64xf32, #tpu.memory_space<vmem>>, %arg11: memref<1x64x32xbf16, #tpu.memory_space<vmem>>, %arg12: memref<1x1x32xf32, #tpu.memory_space<vmem>>, %arg13: memref<1x1x32xf32, #tpu.memory_space<vmem>>, %arg14: memref<1x1x32xf32, #tpu.memory_space<vmem>>, %arg15: memref<8x32xf32, #tpu.memory_space<vmem>>) attributes {dimension_semantics = [#tpu.dimension_semantics<parallel>, #tpu.dimension_semantics<arbitrary>], iteration_bounds = array<i64: 2, 2>, scalar_prefetch = 0 : i64, scratch_operands = 0 : i64, tpu.core_type = #tpu.core_type<tc>, window_params = [{transform_indices = @transform_0, window_bounds = array<i64: 8, 32>}, {transform_indices = @transform_1, window_bounds = array<i64: 1, 32, 96>}, {transform_indices = @transform_2, window_bounds = array<i64: 1, 1, 96>}, {transform_indices = @transform_3, window_bounds = array<i64: 1, 4, 8, 32>}, {transform_indices = @transform_4, window_bounds = array<i64: 1, 1, 32>}, {transform_indices = @transform_5, window_bounds = array<i64: 1, 1, 32>}, {transform_indices = @transform_6, window_bounds = array<i64: 1, 1, 32>}, {transform_indices = @transform_7, window_bounds = array<i64: 1, 32, 64>}, {transform_indices = @transform_8, window_bounds = array<i64: 1, 1, 64>}, {transform_indices = @transform_9, window_bounds = array<i64: 1, 64, 32>}, {transform_indices = @transform_10, window_bounds = array<i64: 1, 1, 32>}, {transform_indices = @transform_11, window_bounds = array<i64: 1, 1, 32>}, {transform_indices = @transform_12, window_bounds = array<i64: 1, 1, 32>}, {transform_indices = @transform_13, window_bounds = array<i64: 8, 32>}]} {
    %c0_i32 = arith.constant 0 : i32
    %0 = arith.cmpi eq, %arg1, %c0_i32 : i32
    %1 = arith.extui %0 : i1 to i32
    %c0_i32_0 = arith.constant 0 : i32
    %2 = arith.cmpi ne, %1, %c0_i32_0 : i32
    scf.if %2 {
      %c0_75 = arith.constant 0 : index
      %c0_76 = arith.constant 0 : index
      %204 = vector.load %arg2[%c0_75, %c0_76] : memref<8x32xf32, #tpu.memory_space<vmem>>, vector<8x32xf32>
      %c0_77 = arith.constant 0 : index
      %c0_78 = arith.constant 0 : index
      %205 = vector.load %arg15[%c0_77, %c0_78] : memref<8x32xf32, #tpu.memory_space<vmem>>, vector<8x32xf32>
      tpu.vector_store %arg15[%c0_77, %c0_78], %204 {strides = array<i32>} : memref<8x32xf32, #tpu.memory_space<vmem>>, vector<8x32xf32>,
    } else {
    }
    %c0 = arith.constant 0 : index
    %c0_1 = arith.constant 0 : index
    %3 = vector.load %arg15[%c0, %c0_1] : memref<8x32xf32, #tpu.memory_space<vmem>>, vector<8x32xf32>
    %4 = arith.truncf %3 : vector<8x32xf32> to vector<8x32xbf16>
    %c0_2 = arith.constant 0 : index
    %c0_3 = arith.constant 0 : index
    %c0_4 = arith.constant 0 : index
    %5 = vector.load %arg3[%c0_2, %c0_3, %c0_4] : memref<1x32x96xbf16, #tpu.memory_space<vmem>>, vector<1x32x96xbf16>
    %6 = vector.shape_cast %5 : vector<1x32x96xbf16> to vector<32x96xbf16>
    %cst = arith.constant dense<0.000000e+00> : vector<8x96xf32>
    %7 = tpu.matmul %4, %6, %cst {dimension_numbers = #tpu.dot_dimension_numbers<[1], [0], [0], [1], [0, 0, 1, 1], [], []>} : vector<8x32xbf16>, vector<32x96xbf16>, vector<8x96xf32> -> vector<8x96xf32>
    %c0_5 = arith.constant 0 : index
    %c0_6 = arith.constant 0 : index
    %c0_7 = arith.constant 0 : index
    %8 = vector.load %arg4[%c0_5, %c0_6, %c0_7] : memref<1x1x96xf32, #tpu.memory_space<vmem>>, vector<1x1x96xf32>
    %9 = vector.shape_cast %8 : vector<1x1x96xf32> to vector<1x96xf32>
    %10 = vector.broadcast %9 : vector<1x96xf32> to vector<8x96xf32>
    %11 = arith.addf %7, %10 : vector<8x96xf32>
    %c0_8 = arith.constant 0 : index
    %c0_9 = arith.constant 0 : index
    %c0_10 = arith.constant 0 : index
    %c0_11 = arith.constant 0 : index
    %12 = vector.load %arg5[%c0_8, %c0_9, %c0_10, %c0_11] : memref<1x4x8x32xbf16, #tpu.memory_space<vmem>>, vector<1x4x8x32xbf16>
    %13 = vector.shape_cast %12 : vector<1x4x8x32xbf16> to vector<4x8x32xbf16>
    %cst_12 = arith.constant 0.000000e+00 : f32
    %14 = vector.broadcast %cst_12 : f32 to vector<8x32xf32>
    %15 = vector.extract_strided_slice %11 {offsets = [0, 0], sizes = [8, 8], strides = [1, 1]} : vector<8x96xf32> to vector<8x8xf32>
    %16 = vector.extract_strided_slice %11 {offsets = [0, 32], sizes = [8, 8], strides = [1, 1]} : vector<8x96xf32> to vector<8x8xf32>
    %17 = vector.extract_strided_slice %11 {offsets = [0, 64], sizes = [8, 8], strides = [1, 1]} : vector<8x96xf32> to vector<8x8xf32>
    %18 = vector.shape_cast %15 : vector<8x8xf32> to vector<1x8x8xf32>
    %19 = arith.truncf %18 : vector<1x8x8xf32> to vector<1x8x8xbf16>
    %20 = vector.shape_cast %16 : vector<8x8xf32> to vector<1x8x8xf32>
    %21 = arith.truncf %20 : vector<1x8x8xf32> to vector<1x8x8xbf16>
    %22 = vector.shape_cast %17 : vector<8x8xf32> to vector<1x8x8xf32>
    %23 = arith.truncf %22 : vector<1x8x8xf32> to vector<1x8x8xbf16>
    "tpu.trace_start"() <{level = 10 : i32, message = "bqd,bkd->bqk"}> : () -> ()
    %cst_13 = arith.constant dense<0.000000e+00> : vector<1x8x8xf32>
    %24 = tpu.matmul %19, %21, %cst_13 {dimension_numbers = #tpu.dot_dimension_numbers<[2], [2], [1], [1], [0, 0, 0, 1, 1, 1], [0], [0]>} : vector<1x8x8xbf16>, vector<1x8x8xbf16>, vector<1x8x8xf32> -> vector<1x8x8xf32>
    "tpu.trace_stop"() : () -> ()
    %cst_14 = arith.constant dense<0xFF800000> : vector<1x8xf32>
    %25 = vector.multi_reduction <maximumf>, %24, %cst_14 [2] : vector<1x8x8xf32> to vector<1x8xf32>
    %26 = vector.shape_cast %25 : vector<1x8xf32> to vector<1x8x1xf32>
    %27 = vector.broadcast %26 : vector<1x8x1xf32> to vector<1x8x8xf32>
    %28 = arith.subf %24, %27 : vector<1x8x8xf32>
    %29 = math.exp %28 : vector<1x8x8xf32>
    %cst_15 = arith.constant dense<0.000000e+00> : vector<1x8xf32>
    %30 = vector.multi_reduction <add>, %29, %cst_15 [2] : vector<1x8x8xf32> to vector<1x8xf32>
    %31 = vector.shape_cast %30 : vector<1x8xf32> to vector<1x8x1xf32>
    %32 = tpu.reciprocal %31 : vector<1x8x1xf32> -> vector<1x8x1xf32>
    %33 = vector.broadcast %32 : vector<1x8x1xf32> to vector<1x8x8xf32>
    %34 = arith.mulf %29, %33 : vector<1x8x8xf32>
    %35 = arith.truncf %34 : vector<1x8x8xf32> to vector<1x8x8xbf16>
    "tpu.trace_start"() <{level = 10 : i32, message = "bqk,bkd->bqd"}> : () -> ()
    %cst_16 = arith.constant dense<0.000000e+00> : vector<1x8x8xf32>
    %36 = tpu.matmul %35, %23, %cst_16 {dimension_numbers = #tpu.dot_dimension_numbers<[2], [1], [1], [2], [0, 0, 0, 1, 1, 2], [0], [0]>} : vector<1x8x8xbf16>, vector<1x8x8xbf16>, vector<1x8x8xf32> -> vector<1x8x8xf32>
    "tpu.trace_stop"() : () -> ()
    %37 = vector.shape_cast %36 : vector<1x8x8xf32> to vector<8x8xf32>
    %38 = arith.truncf %37 : vector<8x8xf32> to vector<8x8xbf16>
    %39 = vector.extract_strided_slice %13 {offsets = [0, 0, 0], sizes = [1, 8, 32], strides = [1, 1, 1]} : vector<4x8x32xbf16> to vector<1x8x32xbf16>
    %40 = vector.shape_cast %39 : vector<1x8x32xbf16> to vector<8x32xbf16>
    %cst_17 = arith.constant dense<0.000000e+00> : vector<8x32xf32>
    %41 = tpu.matmul %38, %40, %cst_17 {dimension_numbers = #tpu.dot_dimension_numbers<[1], [0], [0], [1], [0, 0, 1, 1], [], []>} : vector<8x8xbf16>, vector<8x32xbf16>, vector<8x32xf32> -> vector<8x32xf32>
    %42 = arith.addf %14, %41 : vector<8x32xf32>
    %43 = vector.extract_strided_slice %11 {offsets = [0, 8], sizes = [8, 8], strides = [1, 1]} : vector<8x96xf32> to vector<8x8xf32>
    %44 = vector.extract_strided_slice %11 {offsets = [0, 40], sizes = [8, 8], strides = [1, 1]} : vector<8x96xf32> to vector<8x8xf32>
    %45 = vector.extract_strided_slice %11 {offsets = [0, 72], sizes = [8, 8], strides = [1, 1]} : vector<8x96xf32> to vector<8x8xf32>
    %46 = vector.shape_cast %43 : vector<8x8xf32> to vector<1x8x8xf32>
    %47 = arith.truncf %46 : vector<1x8x8xf32> to vector<1x8x8xbf16>
    %48 = vector.shape_cast %44 : vector<8x8xf32> to vector<1x8x8xf32>
    %49 = arith.truncf %48 : vector<1x8x8xf32> to vector<1x8x8xbf16>
    %50 = vector.shape_cast %45 : vector<8x8xf32> to vector<1x8x8xf32>
    %51 = arith.truncf %50 : vector<1x8x8xf32> to vector<1x8x8xbf16>
    "tpu.trace_start"() <{level = 10 : i32, message = "bqd,bkd->bqk"}> : () -> ()
    %cst_18 = arith.constant dense<0.000000e+00> : vector<1x8x8xf32>
    %52 = tpu.matmul %47, %49, %cst_18 {dimension_numbers = #tpu.dot_dimension_numbers<[2], [2], [1], [1], [0, 0, 0, 1, 1, 1], [0], [0]>} : vector<1x8x8xbf16>, vector<1x8x8xbf16>, vector<1x8x8xf32> -> vector<1x8x8xf32>
    "tpu.trace_stop"() : () -> ()
    %cst_19 = arith.constant dense<0xFF800000> : vector<1x8xf32>
    %53 = vector.multi_reduction <maximumf>, %52, %cst_19 [2] : vector<1x8x8xf32> to vector<1x8xf32>
    %54 = vector.shape_cast %53 : vector<1x8xf32> to vector<1x8x1xf32>
    %55 = vector.broadcast %54 : vector<1x8x1xf32> to vector<1x8x8xf32>
    %56 = arith.subf %52, %55 : vector<1x8x8xf32>
    %57 = math.exp %56 : vector<1x8x8xf32>
    %cst_20 = arith.constant dense<0.000000e+00> : vector<1x8xf32>
    %58 = vector.multi_reduction <add>, %57, %cst_20 [2] : vector<1x8x8xf32> to vector<1x8xf32>
    %59 = vector.shape_cast %58 : vector<1x8xf32> to vector<1x8x1xf32>
    %60 = tpu.reciprocal %59 : vector<1x8x1xf32> -> vector<1x8x1xf32>
    %61 = vector.broadcast %60 : vector<1x8x1xf32> to vector<1x8x8xf32>
    %62 = arith.mulf %57, %61 : vector<1x8x8xf32>
    %63 = arith.truncf %62 : vector<1x8x8xf32> to vector<1x8x8xbf16>
    "tpu.trace_start"() <{level = 10 : i32, message = "bqk,bkd->bqd"}> : () -> ()
    %cst_21 = arith.constant dense<0.000000e+00> : vector<1x8x8xf32>
    %64 = tpu.matmul %63, %51, %cst_21 {dimension_numbers = #tpu.dot_dimension_numbers<[2], [1], [1], [2], [0, 0, 0, 1, 1, 2], [0], [0]>} : vector<1x8x8xbf16>, vector<1x8x8xbf16>, vector<1x8x8xf32> -> vector<1x8x8xf32>
    "tpu.trace_stop"() : () -> ()
    %65 = vector.shape_cast %64 : vector<1x8x8xf32> to vector<8x8xf32>
    %66 = arith.truncf %65 : vector<8x8xf32> to vector<8x8xbf16>
    %67 = vector.extract_strided_slice %13 {offsets = [1, 0, 0], sizes = [1, 8, 32], strides = [1, 1, 1]} : vector<4x8x32xbf16> to vector<1x8x32xbf16>
    %68 = vector.shape_cast %67 : vector<1x8x32xbf16> to vector<8x32xbf16>
    %cst_22 = arith.constant dense<0.000000e+00> : vector<8x32xf32>
    %69 = tpu.matmul %66, %68, %cst_22 {dimension_numbers = #tpu.dot_dimension_numbers<[1], [0], [0], [1], [0, 0, 1, 1], [], []>} : vector<8x8xbf16>, vector<8x32xbf16>, vector<8x32xf32> -> vector<8x32xf32>
    %70 = arith.addf %42, %69 : vector<8x32xf32>
    %71 = vector.extract_strided_slice %11 {offsets = [0, 16], sizes = [8, 8], strides = [1, 1]} : vector<8x96xf32> to vector<8x8xf32>
    %72 = vector.extract_strided_slice %11 {offsets = [0, 48], sizes = [8, 8], strides = [1, 1]} : vector<8x96xf32> to vector<8x8xf32>
    %73 = vector.extract_strided_slice %11 {offsets = [0, 80], sizes = [8, 8], strides = [1, 1]} : vector<8x96xf32> to vector<8x8xf32>
    %74 = vector.shape_cast %71 : vector<8x8xf32> to vector<1x8x8xf32>
    %75 = arith.truncf %74 : vector<1x8x8xf32> to vector<1x8x8xbf16>
    %76 = vector.shape_cast %72 : vector<8x8xf32> to vector<1x8x8xf32>
    %77 = arith.truncf %76 : vector<1x8x8xf32> to vector<1x8x8xbf16>
    %78 = vector.shape_cast %73 : vector<8x8xf32> to vector<1x8x8xf32>
    %79 = arith.truncf %78 : vector<1x8x8xf32> to vector<1x8x8xbf16>
    "tpu.trace_start"() <{level = 10 : i32, message = "bqd,bkd->bqk"}> : () -> ()
    %cst_23 = arith.constant dense<0.000000e+00> : vector<1x8x8xf32>
    %80 = tpu.matmul %75, %77, %cst_23 {dimension_numbers = #tpu.dot_dimension_numbers<[2], [2], [1], [1], [0, 0, 0, 1, 1, 1], [0], [0]>} : vector<1x8x8xbf16>, vector<1x8x8xbf16>, vector<1x8x8xf32> -> vector<1x8x8xf32>
    "tpu.trace_stop"() : () -> ()
    %cst_24 = arith.constant dense<0xFF800000> : vector<1x8xf32>
    %81 = vector.multi_reduction <maximumf>, %80, %cst_24 [2] : vector<1x8x8xf32> to vector<1x8xf32>
    %82 = vector.shape_cast %81 : vector<1x8xf32> to vector<1x8x1xf32>
    %83 = vector.broadcast %82 : vector<1x8x1xf32> to vector<1x8x8xf32>
    %84 = arith.subf %80, %83 : vector<1x8x8xf32>
    %85 = math.exp %84 : vector<1x8x8xf32>
    %cst_25 = arith.constant dense<0.000000e+00> : vector<1x8xf32>
    %86 = vector.multi_reduction <add>, %85, %cst_25 [2] : vector<1x8x8xf32> to vector<1x8xf32>
    %87 = vector.shape_cast %86 : vector<1x8xf32> to vector<1x8x1xf32>
    %88 = tpu.reciprocal %87 : vector<1x8x1xf32> -> vector<1x8x1xf32>
    %89 = vector.broadcast %88 : vector<1x8x1xf32> to vector<1x8x8xf32>
    %90 = arith.mulf %85, %89 : vector<1x8x8xf32>
    %91 = arith.truncf %90 : vector<1x8x8xf32> to vector<1x8x8xbf16>
    "tpu.trace_start"() <{level = 10 : i32, message = "bqk,bkd->bqd"}> : () -> ()
    %cst_26 = arith.constant dense<0.000000e+00> : vector<1x8x8xf32>
    %92 = tpu.matmul %91, %79, %cst_26 {dimension_numbers = #tpu.dot_dimension_numbers<[2], [1], [1], [2], [0, 0, 0, 1, 1, 2], [0], [0]>} : vector<1x8x8xbf16>, vector<1x8x8xbf16>, vector<1x8x8xf32> -> vector<1x8x8xf32>
    "tpu.trace_stop"() : () -> ()
    %93 = vector.shape_cast %92 : vector<1x8x8xf32> to vector<8x8xf32>
    %94 = arith.truncf %93 : vector<8x8xf32> to vector<8x8xbf16>
    %95 = vector.extract_strided_slice %13 {offsets = [2, 0, 0], sizes = [1, 8, 32], strides = [1, 1, 1]} : vector<4x8x32xbf16> to vector<1x8x32xbf16>
    %96 = vector.shape_cast %95 : vector<1x8x32xbf16> to vector<8x32xbf16>
    %cst_27 = arith.constant dense<0.000000e+00> : vector<8x32xf32>
    %97 = tpu.matmul %94, %96, %cst_27 {dimension_numbers = #tpu.dot_dimension_numbers<[1], [0], [0], [1], [0, 0, 1, 1], [], []>} : vector<8x8xbf16>, vector<8x32xbf16>, vector<8x32xf32> -> vector<8x32xf32>
    %98 = arith.addf %70, %97 : vector<8x32xf32>
    %99 = vector.extract_strided_slice %11 {offsets = [0, 24], sizes = [8, 8], strides = [1, 1]} : vector<8x96xf32> to vector<8x8xf32>
    %100 = vector.extract_strided_slice %11 {offsets = [0, 56], sizes = [8, 8], strides = [1, 1]} : vector<8x96xf32> to vector<8x8xf32>
    %101 = vector.extract_strided_slice %11 {offsets = [0, 88], sizes = [8, 8], strides = [1, 1]} : vector<8x96xf32> to vector<8x8xf32>
    %102 = vector.shape_cast %99 : vector<8x8xf32> to vector<1x8x8xf32>
    %103 = arith.truncf %102 : vector<1x8x8xf32> to vector<1x8x8xbf16>
    %104 = vector.shape_cast %100 : vector<8x8xf32> to vector<1x8x8xf32>
    %105 = arith.truncf %104 : vector<1x8x8xf32> to vector<1x8x8xbf16>
    %106 = vector.shape_cast %101 : vector<8x8xf32> to vector<1x8x8xf32>
    %107 = arith.truncf %106 : vector<1x8x8xf32> to vector<1x8x8xbf16>
    "tpu.trace_start"() <{level = 10 : i32, message = "bqd,bkd->bqk"}> : () -> ()
    %cst_28 = arith.constant dense<0.000000e+00> : vector<1x8x8xf32>
    %108 = tpu.matmul %103, %105, %cst_28 {dimension_numbers = #tpu.dot_dimension_numbers<[2], [2], [1], [1], [0, 0, 0, 1, 1, 1], [0], [0]>} : vector<1x8x8xbf16>, vector<1x8x8xbf16>, vector<1x8x8xf32> -> vector<1x8x8xf32>
    "tpu.trace_stop"() : () -> ()
    %cst_29 = arith.constant dense<0xFF800000> : vector<1x8xf32>
    %109 = vector.multi_reduction <maximumf>, %108, %cst_29 [2] : vector<1x8x8xf32> to vector<1x8xf32>
    %110 = vector.shape_cast %109 : vector<1x8xf32> to vector<1x8x1xf32>
    %111 = vector.broadcast %110 : vector<1x8x1xf32> to vector<1x8x8xf32>
    %112 = arith.subf %108, %111 : vector<1x8x8xf32>
    %113 = math.exp %112 : vector<1x8x8xf32>
    %cst_30 = arith.constant dense<0.000000e+00> : vector<1x8xf32>
    %114 = vector.multi_reduction <add>, %113, %cst_30 [2] : vector<1x8x8xf32> to vector<1x8xf32>
    %115 = vector.shape_cast %114 : vector<1x8xf32> to vector<1x8x1xf32>
    %116 = tpu.reciprocal %115 : vector<1x8x1xf32> -> vector<1x8x1xf32>
    %117 = vector.broadcast %116 : vector<1x8x1xf32> to vector<1x8x8xf32>
    %118 = arith.mulf %113, %117 : vector<1x8x8xf32>
    %119 = arith.truncf %118 : vector<1x8x8xf32> to vector<1x8x8xbf16>
    "tpu.trace_start"() <{level = 10 : i32, message = "bqk,bkd->bqd"}> : () -> ()
    %cst_31 = arith.constant dense<0.000000e+00> : vector<1x8x8xf32>
    %120 = tpu.matmul %119, %107, %cst_31 {dimension_numbers = #tpu.dot_dimension_numbers<[2], [1], [1], [2], [0, 0, 0, 1, 1, 2], [0], [0]>} : vector<1x8x8xbf16>, vector<1x8x8xbf16>, vector<1x8x8xf32> -> vector<1x8x8xf32>
    "tpu.trace_stop"() : () -> ()
    %121 = vector.shape_cast %120 : vector<1x8x8xf32> to vector<8x8xf32>
    %122 = arith.truncf %121 : vector<8x8xf32> to vector<8x8xbf16>
    %123 = vector.extract_strided_slice %13 {offsets = [3, 0, 0], sizes = [1, 8, 32], strides = [1, 1, 1]} : vector<4x8x32xbf16> to vector<1x8x32xbf16>
    %124 = vector.shape_cast %123 : vector<1x8x32xbf16> to vector<8x32xbf16>
    %cst_32 = arith.constant dense<0.000000e+00> : vector<8x32xf32>
    %125 = tpu.matmul %122, %124, %cst_32 {dimension_numbers = #tpu.dot_dimension_numbers<[1], [0], [0], [1], [0, 0, 1, 1], [], []>} : vector<8x8xbf16>, vector<8x32xbf16>, vector<8x32xf32> -> vector<8x32xf32>
    %126 = arith.addf %98, %125 : vector<8x32xf32>
    %c0_33 = arith.constant 0 : index
    %c0_34 = arith.constant 0 : index
    %c0_35 = arith.constant 0 : index
    %127 = vector.load %arg6[%c0_33, %c0_34, %c0_35] : memref<1x1x32xf32, #tpu.memory_space<vmem>>, vector<1x1x32xf32>
    %128 = vector.shape_cast %127 : vector<1x1x32xf32> to vector<1x32xf32>
    %129 = vector.broadcast %128 : vector<1x32xf32> to vector<8x32xf32>
    %130 = arith.addf %126, %129 : vector<8x32xf32>
    %131 = arith.addf %3, %130 : vector<8x32xf32>
    %c0_36 = arith.constant 0 : index
    %c0_37 = arith.constant 0 : index
    %c0_38 = arith.constant 0 : index
    %132 = vector.load %arg7[%c0_36, %c0_37, %c0_38] : memref<1x1x32xf32, #tpu.memory_space<vmem>>, vector<1x1x32xf32>
    %133 = vector.shape_cast %132 : vector<1x1x32xf32> to vector<1x32xf32>
    %c0_39 = arith.constant 0 : index
    %c0_40 = arith.constant 0 : index
    %c0_41 = arith.constant 0 : index
    %134 = vector.load %arg8[%c0_39, %c0_40, %c0_41] : memref<1x1x32xf32, #tpu.memory_space<vmem>>, vector<1x1x32xf32>
    %135 = vector.shape_cast %134 : vector<1x1x32xf32> to vector<1x32xf32>
    %cst_42 = arith.constant dense<0.000000e+00> : vector<8xf32>
    %136 = vector.multi_reduction <add>, %131, %cst_42 [1] : vector<8x32xf32> to vector<8xf32>
    %137 = vector.shape_cast %136 : vector<8xf32> to vector<8x1xf32>
    %cst_43 = arith.constant 3.200000e+01 : f32
    %138 = vector.broadcast %cst_43 : f32 to vector<8x1xf32>
    %139 = arith.divf %137, %138 : vector<8x1xf32>
    %140 = vector.broadcast %139 : vector<8x1xf32> to vector<8x32xf32>
    %141 = arith.subf %131, %140 : vector<8x32xf32>
    %142 = arith.mulf %141, %141 : vector<8x32xf32>
    %cst_44 = arith.constant dense<0.000000e+00> : vector<8xf32>
    %143 = vector.multi_reduction <add>, %142, %cst_44 [1] : vector<8x32xf32> to vector<8xf32>
    %144 = vector.shape_cast %143 : vector<8xf32> to vector<8x1xf32>
    %cst_45 = arith.constant 3.200000e+01 : f32
    %145 = vector.broadcast %cst_45 : f32 to vector<8x1xf32>
    %146 = arith.divf %144, %145 : vector<8x1xf32>
    %147 = vector.broadcast %139 : vector<8x1xf32> to vector<8x32xf32>
    %148 = arith.subf %131, %147 : vector<8x32xf32>
    %cst_46 = arith.constant 9.99999974E-6 : f32
    %149 = vector.broadcast %cst_46 : f32 to vector<8x1xf32>
    %150 = arith.addf %146, %149 : vector<8x1xf32>
    %151 = math.rsqrt %150 : vector<8x1xf32>
    %152 = vector.broadcast %151 : vector<8x1xf32> to vector<8x32xf32>
    %153 = arith.mulf %148, %152 : vector<8x32xf32>
    %154 = vector.broadcast %133 : vector<1x32xf32> to vector<8x32xf32>
    %155 = arith.mulf %153, %154 : vector<8x32xf32>
    %156 = vector.broadcast %135 : vector<1x32xf32> to vector<8x32xf32>
    %157 = arith.addf %155, %156 : vector<8x32xf32>
    %158 = arith.truncf %157 : vector<8x32xf32> to vector<8x32xbf16>
    %c0_47 = arith.constant 0 : index
    %c0_48 = arith.constant 0 : index
    %c0_49 = arith.constant 0 : index
    %159 = vector.load %arg9[%c0_47, %c0_48, %c0_49] : memref<1x32x64xbf16, #tpu.memory_space<vmem>>, vector<1x32x64xbf16>
    %160 = vector.shape_cast %159 : vector<1x32x64xbf16> to vector<32x64xbf16>
    %cst_50 = arith.constant dense<0.000000e+00> : vector<8x64xf32>
    %161 = tpu.matmul %158, %160, %cst_50 {dimension_numbers = #tpu.dot_dimension_numbers<[1], [0], [0], [1], [0, 0, 1, 1], [], []>} : vector<8x32xbf16>, vector<32x64xbf16>, vector<8x64xf32> -> vector<8x64xf32>
    %c0_51 = arith.constant 0 : index
    %c0_52 = arith.constant 0 : index
    %c0_53 = arith.constant 0 : index
    %162 = vector.load %arg10[%c0_51, %c0_52, %c0_53] : memref<1x1x64xf32, #tpu.memory_space<vmem>>, vector<1x1x64xf32>
    %163 = vector.shape_cast %162 : vector<1x1x64xf32> to vector<1x64xf32>
    %164 = vector.broadcast %163 : vector<1x64xf32> to vector<8x64xf32>
    %165 = arith.addf %161, %164 : vector<8x64xf32>
    %cst_54 = arith.constant 0.000000e+00 : f32
    %166 = vector.broadcast %cst_54 : f32 to vector<8x64xf32>
    %167 = arith.maximumf %165, %166 : vector<8x64xf32>
    %168 = arith.truncf %167 : vector<8x64xf32> to vector<8x64xbf16>
    %c0_55 = arith.constant 0 : index
    %c0_56 = arith.constant 0 : index
    %c0_57 = arith.constant 0 : index
    %169 = vector.load %arg11[%c0_55, %c0_56, %c0_57] : memref<1x64x32xbf16, #tpu.memory_space<vmem>>, vector<1x64x32xbf16>
    %170 = vector.shape_cast %169 : vector<1x64x32xbf16> to vector<64x32xbf16>
    %cst_58 = arith.constant dense<0.000000e+00> : vector<8x32xf32>
    %171 = tpu.matmul %168, %170, %cst_58 {dimension_numbers = #tpu.dot_dimension_numbers<[1], [0], [0], [1], [0, 0, 1, 1], [], []>} : vector<8x64xbf16>, vector<64x32xbf16>, vector<8x32xf32> -> vector<8x32xf32>
    %c0_59 = arith.constant 0 : index
    %c0_60 = arith.constant 0 : index
    %c0_61 = arith.constant 0 : index
    %172 = vector.load %arg12[%c0_59, %c0_60, %c0_61] : memref<1x1x32xf32, #tpu.memory_space<vmem>>, vector<1x1x32xf32>
    %173 = vector.shape_cast %172 : vector<1x1x32xf32> to vector<1x32xf32>
    %174 = vector.broadcast %173 : vector<1x32xf32> to vector<8x32xf32>
    %175 = arith.addf %171, %174 : vector<8x32xf32>
    %176 = arith.addf %157, %175 : vector<8x32xf32>
    %c0_62 = arith.constant 0 : index
    %c0_63 = arith.constant 0 : index
    %c0_64 = arith.constant 0 : index
    %177 = vector.load %arg13[%c0_62, %c0_63, %c0_64] : memref<1x1x32xf32, #tpu.memory_space<vmem>>, vector<1x1x32xf32>
    %178 = vector.shape_cast %177 : vector<1x1x32xf32> to vector<1x32xf32>
    %c0_65 = arith.constant 0 : index
    %c0_66 = arith.constant 0 : index
    %c0_67 = arith.constant 0 : index
    %179 = vector.load %arg14[%c0_65, %c0_66, %c0_67] : memref<1x1x32xf32, #tpu.memory_space<vmem>>, vector<1x1x32xf32>
    %180 = vector.shape_cast %179 : vector<1x1x32xf32> to vector<1x32xf32>
    %cst_68 = arith.constant dense<0.000000e+00> : vector<8xf32>
    %181 = vector.multi_reduction <add>, %176, %cst_68 [1] : vector<8x32xf32> to vector<8xf32>
    %182 = vector.shape_cast %181 : vector<8xf32> to vector<8x1xf32>
    %cst_69 = arith.constant 3.200000e+01 : f32
    %183 = vector.broadcast %cst_69 : f32 to vector<8x1xf32>
    %184 = arith.divf %182, %183 : vector<8x1xf32>
    %185 = vector.broadcast %184 : vector<8x1xf32> to vector<8x32xf32>
    %186 = arith.subf %176, %185 : vector<8x32xf32>
    %187 = arith.mulf %186, %186 : vector<8x32xf32>
    %cst_70 = arith.constant dense<0.000000e+00> : vector<8xf32>
    %188 = vector.multi_reduction <add>, %187, %cst_70 [1] : vector<8x32xf32> to vector<8xf32>
    %189 = vector.shape_cast %188 : vector<8xf32> to vector<8x1xf32>
    %cst_71 = arith.constant 3.200000e+01 : f32
    %190 = vector.broadcast %cst_71 : f32 to vector<8x1xf32>
    %191 = arith.divf %189, %190 : vector<8x1xf32>
    %192 = vector.broadcast %184 : vector<8x1xf32> to vector<8x32xf32>
    %193 = arith.subf %176, %192 : vector<8x32xf32>
    %cst_72 = arith.constant 9.99999974E-6 : f32
    %194 = vector.broadcast %cst_72 : f32 to vector<8x1xf32>
    %195 = arith.addf %191, %194 : vector<8x1xf32>
    %196 = math.rsqrt %195 : vector<8x1xf32>
    %197 = vector.broadcast %196 : vector<8x1xf32> to vector<8x32xf32>
    %198 = arith.mulf %193, %197 : vector<8x32xf32>
    %199 = vector.broadcast %178 : vector<1x32xf32> to vector<8x32xf32>
    %200 = arith.mulf %198, %199 : vector<8x32xf32>
    %201 = vector.broadcast %180 : vector<1x32xf32> to vector<8x32xf32>
    %202 = arith.addf %200, %201 : vector<8x32xf32>
    %c0_73 = arith.constant 0 : index
    %c0_74 = arith.constant 0 : index
    %203 = vector.load %arg15[%c0_73, %c0_74] : memref<8x32xf32, #tpu.memory_space<vmem>>, vector<8x32xf32>
    tpu.vector_store %arg15[%c0_73, %c0_74], %202 {strides = array<i32>} : memref<8x32xf32, #tpu.memory_space<vmem>>, vector<8x32xf32>,
    return
  }
  func.func @transform_0(%arg0: i32, %arg1: i32) -> (i32, i32) {
    %c0_i32 = arith.constant 0 : i32
    %c0_i32_0 = arith.constant 0 : i32
    return %arg0, %c0_i32 : i32, i32
  }
  func.func @transform_1(%arg0: i32, %arg1: i32) -> (i32, i32, i32) {
    %c0_i32 = arith.constant 0 : i32
    %c0_i32_0 = arith.constant 0 : i32
    %c0_i32_1 = arith.constant 0 : i32
    return %arg1, %c0_i32, %c0_i32_0 : i32, i32, i32
  }
  func.func @transform_2(%arg0: i32, %arg1: i32) -> (i32, i32, i32) {
    %c0_i32 = arith.constant 0 : i32
    %c0_i32_0 = arith.constant 0 : i32
    %c0_i32_1 = arith.constant 0 : i32
    return %arg1, %c0_i32, %c0_i32_0 : i32, i32, i32
  }
  func.func @transform_3(%arg0: i32, %arg1: i32) -> (i32, i32, i32, i32) {
    %c0_i32 = arith.constant 0 : i32
    %c0_i32_0 = arith.constant 0 : i32
    %c0_i32_1 = arith.constant 0 : i32
    %c0_i32_2 = arith.constant 0 : i32
    return %arg1, %c0_i32, %c0_i32_0, %c0_i32_1 : i32, i32, i32, i32
  }
  func.func @transform_4(%arg0: i32, %arg1: i32) -> (i32, i32, i32) {
    %c0_i32 = arith.constant 0 : i32
    %c0_i32_0 = arith.constant 0 : i32
    %c0_i32_1 = arith.constant 0 : i32
    return %arg1, %c0_i32, %c0_i32_0 : i32, i32, i32
  }
  func.func @transform_5(%arg0: i32, %arg1: i32) -> (i32, i32, i32) {
    %c0_i32 = arith.constant 0 : i32
    %c0_i32_0 = arith.constant 0 : i32
    %c0_i32_1 = arith.constant 0 : i32
    return %arg1, %c0_i32, %c0_i32_0 : i32, i32, i32
  }
  func.func @transform_6(%arg0: i32, %arg1: i32) -> (i32, i32, i32) {
    %c0_i32 = arith.constant 0 : i32
    %c0_i32_0 = arith.constant 0 : i32
    %c0_i32_1 = arith.constant 0 : i32
    return %arg1, %c0_i32, %c0_i32_0 : i32, i32, i32
  }
  func.func @transform_7(%arg0: i32, %arg1: i32) -> (i32, i32, i32) {
    %c0_i32 = arith.constant 0 : i32
    %c0_i32_0 = arith.constant 0 : i32
    %c0_i32_1 = arith.constant 0 : i32
    return %arg1, %c0_i32, %c0_i32_0 : i32, i32, i32
  }
  func.func @transform_8(%arg0: i32, %arg1: i32) -> (i32, i32, i32) {
    %c0_i32 = arith.constant 0 : i32
    %c0_i32_0 = arith.constant 0 : i32
    %c0_i32_1 = arith.constant 0 : i32
    return %arg1, %c0_i32, %c0_i32_0 : i32, i32, i32
  }
  func.func @transform_9(%arg0: i32, %arg1: i32) -> (i32, i32, i32) {
    %c0_i32 = arith.constant 0 : i32
    %c0_i32_0 = arith.constant 0 : i32
    %c0_i32_1 = arith.constant 0 : i32
    return %arg1, %c0_i32, %c0_i32_0 : i32, i32, i32
  }
  func.func @transform_10(%arg0: i32, %arg1: i32) -> (i32, i32, i32) {
    %c0_i32 = arith.constant 0 : i32
    %c0_i32_0 = arith.constant 0 : i32
    %c0_i32_1 = arith.constant 0 : i32
    return %arg1, %c0_i32, %c0_i32_0 : i32, i32, i32
  }
  func.func @transform_11(%arg0: i32, %arg1: i32) -> (i32, i32, i32) {
    %c0_i32 = arith.constant 0 : i32
    %c0_i32_0 = arith.constant 0 : i32
    %c0_i32_1 = arith.constant 0 : i32
    return %arg1, %c0_i32, %c0_i32_0 : i32, i32, i32
  }
  func.func @transform_12(%arg0: i32, %arg1: i32) -> (i32, i32, i32) {
    %c0_i32 = arith.constant 0 : i32
    %c0_i32_0 = arith.constant 0 : i32
    %c0_i32_1 = arith.constant 0 : i32
    return %arg1, %c0_i32, %c0_i32_0 : i32, i32, i32
  }
  func.func @transform_13(%arg0: i32, %arg1: i32) -> (i32, i32) {
    %c0_i32 = arith.constant 0 : i32
    %c0_i32_0 = arith.constant 0 : i32
    return %arg0, %c0_i32 : i32, i32
  }
}

</mosaic_0001>

<bundles_post_ra>
// kernel: transformer_encoder.1
= control target key start
LH: loop header
LB: loop body
LE: loop exit
PB: predicated region body
PF: predicated region fallthrough
CT: control target
= control target key end

     0   :  { %s2541_s0 = inlined_call_operand.hbm [shape: f32[16,32], index: 0, kind: input, shape index: {}]   ;;  %s2542_s1 = inlined_call_operand.vmem [shape: bf16[2,32,96], index: 1, kind: input, shape index: {}]   ;;  %s2543_s2 = inlined_call_operand.hbm [shape: f32[2,1,96], index: 2, kind: input, shape index: {}]   ;;  %s2544_s3 = inlined_call_operand.vmem [shape: bf16[2,4,8,32], index: 3, kind: input, shape index: {}]   ;;  %s2545_s4 = inlined_call_operand.vmem [shape: f32[2,1,32], index: 4, kind: input, shape index: {}]   ;;  %s2546_s5 = inlined_call_operand.vmem [shape: f32[2,1,32], index: 5, kind: input, shape index: {}]   ;;  %s2547_s6 = inlined_call_operand.hbm [shape: f32[2,1,32], index: 6, kind: input, shape index: {}]   ;;  %s2548_s7 = inlined_call_operand.vmem [shape: bf16[2,32,64], index: 7, kind: input, shape index: {}]   ;;  %s2549_s8 = inlined_call_operand.vmem [shape: f32[2,1,64], index: 8, kind: input, shape index: {}]   ;;  %s2550_s9 = inlined_call_operand.vmem [shape: bf16[2,64,32], index: 9, kind: input, shape index: {}]   ;;  %s2551_s10 = inlined_call_operand.vmem [shape: f32[2,1,32], index: 10, kind: input, shape index: {}]   ;;  %s2552_s11 = inlined_call_operand.vmem [shape: f32[2,1,32], index: 11, kind: input, shape index: {}]   ;;  %s2553_s12 = inlined_call_operand.hbm [shape: f32[2,1,32], index: 12, kind: input, shape index: {}]   ;;  %s2554_s13 = inlined_call_operand.hbm [shape: f32[16,32], index: 13, kind: output, shape index: {}]  }
   0x1   :  { %2568 = sst [smem:[#allocation28_spill]] %s2541_s0 }
   0x2   :  { %2569 = sst [smem:[#allocation29_spill]] %s2542_s1 }
   0x3   :  { %2570 = sst [smem:[#allocation30_spill]] %s2543_s2 }
   0x4   :  { %2571 = sst [smem:[#allocation31_spill]] %s2544_s3 }
   0x5   :  { %2572 = sst [smem:[#allocation32_spill]] %s2546_s5 }
   0x6   :  { %2573 = sst [smem:[#allocation33_spill]] %s2547_s6 }
   0x7   :  { %2574 = sst [smem:[#allocation34_spill]] %s2548_s7 }
   0x8   :  { %2575 = sst [smem:[#allocation35_spill]] %s2549_s8 }
   0x9   :  { %2576 = sst [smem:[#allocation36_spill]] %s2550_s9 }
   0xa   :  { %2577 = sst [smem:[#allocation37_spill]] %s2551_s10 }
   0xb   :  { %2578 = sst [smem:[#allocation38_spill]] %s2552_s11 }
   0xc   :  { %2579 = sst [smem:[#allocation39_spill]] %s2553_s12 }
   0xd   :  { %2580 = sst [smem:[#allocation40_spill]] %s2554_s13 }
   0xe   :  { %18 = vsyncpa [#allocation3], 0 }
   0xf   :  { %20 = vsyncpa [#allocation3 + $0x1], 0 }
  0x10   :  { %21 = vsyncpa [#allocation6], 0 }
  0x11   :  { %23 = vsyncpa [#allocation6 + $0x1], 0 }
  0x12   :  { %24 = vsyncpa [#allocation9], 0 }
  0x13   :  { %26 = vsyncpa [#allocation9 + $0x1], 0 }
  0x14   :  { %27 = vsyncpa [#allocation4], 0 }
  0x15   :  { %29 = vsyncpa [#allocation4 + $0x1], 0  ;;  %s2124_s25 = smov 0   ;;  %s2126_s26 = smov 0  }
  0x16   :  { %s2128_s27 = smov 0   ;;  %s2130_s28 = smov 0  }
  0x17   :  { %s2132_s29 = smov 0   ;;  %s2134_s30 = smov 0  }
  0x18   :  { %s2136_s14 = smov 0   ;;  %s2138_s15 = smov 0  }
  0x19   :  { %s2140_s16 = smov 0   ;;  %s2142_s17 = smov 0  }
  0x1a   :  { %s2144_s18 = smov 0  }
  0x1b LB: > { %2581 = sst [smem:[#allocation15_spill]] %s2008_s27  ;;  %s2178_s19 = sadd.s32 4294967295, %s2040_s18   ;;  %s2040_s18 = sphi %s2144_s18, %s35_s18   ;;  %s2036_s17 = sphi %s2142_s17, %s2637_s17   ;;  %s2032_s16 = sphi %s2140_s16, %s2636_s16   ;;  %s2028_s15 = sphi %s2138_s15, %s2635_s15   ;;  %s2024_s14 = sphi %s2136_s14, %s2634_s14   ;;  %s2020_s30 = sphi %s2134_s30, %s2633_s30   ;;  %s2016_s29 = sphi %s2132_s29, %s2632_s29   ;;  %s2012_s28 = sphi %s2130_s28, %s2631_s28   ;;  %s2008_s27 = sphi %s2128_s27, %s2630_s27   ;;  %s2004_s26 = sphi %s2126_s26, %s2639_s26   ;;  %s2000_s25 = sphi %s2124_s25, %s2638_s25  }
  0x1c   : > { %2582 = sst [smem:[#allocation16_spill]] %s2012_s28  ;;  %s44_s20 = sadd.s32 1, %s2032_s16 }
  0x1d   : > { %2583 = sst [smem:[#allocation17_spill]] %s2016_s29  ;;  %p2181_p0 = scmp.ge.s32.totalorder %s44_s20, 2 }
  0x1e   : > { %2584 = sst [smem:[#allocation18_spill]] %s2020_s30  ;;  %p62_p1 = scmp.eq.s32.totalorder %s2040_s18, 0 }
  0x1f   : > { %2585 = sst [smem:[#allocation19_spill]] %s2028_s15  ;;  %p68_p2 = scmp.eq.s32.totalorder %s2178_s19, 0 }
  0x20   : > { %2586 = sst [smem:[#allocation20_spill]] %s2032_s16  ;;  %s106_s22 = sadd.s32 1, %s2008_s27 }
  0x21   : > { %2587 = sst [smem:[#allocation21_spill]] %s2036_s17  ;;  %s2641_s20 = smov (%p2181_p0, %s44_s20), 0 }
  0x22   : > { %2589 = sst [smem:[#allocation22_spill]] %s2641_s20  ;;  %p113_p3 = scmp.ne.s32.totalorder %s2008_s27, %s2004_s26 }
  0x23   : > { %p119_p4 = scmp.ne.s32.totalorder %s2004_s26, %s2000_s25  ;;  %s103_s23 = ssub.s32 %s2032_s16, %s2641_s20 }
  0x24   : > { %p104_p5 = scmp.eq.s32.totalorder %s103_s23, 0  ;;  %p115_p6 = por %p113_p3, %p62_p1 }
  0x25   : > { %p2201_p7 = por %p119_p4, %p68_p2  ;;  %p1658_p8 = scmp.lt.s32.totalorder %s2040_s18, 4 }
  0x26   : > { %s2207_s13 = scalar_select %p104_p5, %s2008_s27, %s106_s22  }
  0x27   : > { %s456_s15 = sand.u32 1, %s2040_s18   ;;  %s2211_s25 = sand.u32 1, %s2008_s27  }
  0x28   : > { %2591 = sst [smem:[#allocation23_spill]] %s2207_s13  ;;  %s459_s10 = scalar_lea.vmem [#allocation5], %s2211_s25 }
  0x29   : > { %s2592_s2 = sld [smem:[#allocation30_spill]]  ;;  %s466_s9 = sshll.u32 %s459_s10, 4  ;;  %s467_s9 = int_to_ptr.vmem [resolvable:$true] %s466_s9 }
  0x2a   : > { %p2220_p9 = pnand %p1658_p8, %p115_p6  ;;  %p1556_p10 = scmp.ge.s32.totalorder %s2040_s18, 1 }
  0x2b   : > { %p559_p11 = scmp.lt.s32.totalorder %s2040_s18, 5  ;;  %s2226_s11 = scalar_lea.sflag [#allocation6], %s456_s15 }
  0x2c   : > { %s1551_s20 = sadd.s32 4294967294, %s2040_s18   ;;  %p61_p13 = scmp.ne.s32.totalorder %s2020_s30, %s2016_s29 }
  0x2d   : > { %p2231_p12 = pnand %p1556_p10, %p559_p11  ;;  %p67_p4 = scmp.ne.s32.totalorder %s2016_s29, %s2012_s28 }
  0x2e   : > { %p2247_p5 = por %p62_p1, %p61_p13  ;;  %p403_p6 = scmp.eq.s32.totalorder %s2178_s19, 3 }
  0x2f   : > { %s462_s23 = scalar_lea.hbm %s2592_s2, %s2032_s16  ;;  %s54_s2 = sadd.s32 1, %s2020_s30 }
  0x30   : > { %s464_s22 = sshll.u32 %s462_s23, 4  ;;  %s47_s23 = sadd.s32 1, %s2036_s17  ;;  %s465_s22 = int_to_ptr.hbm [resolvable:$true] %s464_s22 }
  0x31   : > { %1647 = dma.hbm_to_vmem [thread:$0]  (!%p2220_p9), %s465_s22, 16, %s467_s9, %s2226_s11  }
  0x32   : > { %s2643_s23 = smov (!%p2181_p0, %s47_s23), %s2036_s17  ;;  %p2256_p10 = por %p68_p2, %p67_p4 }
  0x33   : > { %p49_p3 = scmp.ge.s32.totalorder %s2643_s23, 2  ;;  %p2260_p0 = por %p403_p6, %p61_p13 }
  0x34   : > { %p409_p1 = scmp.eq.s32.totalorder %s1551_s20, 3  ;;  %s429_s27 = sand.u32 1, %s2020_s30  }
  0x35   : > { %s2645_s23 = smov (%p49_p3, %s2643_s23), 0  ;;  %s1554_s7 = sshll.u32 %s429_s27, 3 }
  0x36   : > { %2596 = sst [smem:[#allocation24_spill]] %s2645_s23  ;;  %s51_s22 = ssub.s32 %s2036_s17, %s2645_s23 }
  0x37   : > { %s2598_s21 = scalar_select %p2260_p0, 1, 0 }
  0x38   : > { %p52_p11 = scmp.eq.s32.totalorder %s51_s22, 0  ;;  %p2267_p3 = por %p409_p1, %p67_p4 }
  0x39   : > { %2599 = sst [smem:[#allocation25_spill]] %s2598_s21  ;;  %s1555_s5 = sshll.u32 %s2036_s17, 3 }
  0x3a   : > { %s2600_s28 = scalar_select %p2267_p3, 1, 0 }
  0x3b   : > { %s2272_s8 = scalar_select %p52_p11, %s2020_s30, %s54_s2  }
  0x3c   : > { %2601 = sst [smem:[#allocation26_spill]] %s2600_s28  ;;  %s433_s20 = scalar_lea.vmem [#allocation2], %s1554_s7 }
  0x3d   : > { %2602 = sst [smem:[#allocation27_spill]] %s2272_s8  ;;  %s441_s22 = sshll.u32 %s433_s20, 4  ;;  %s442_s22 = int_to_ptr.vmem [resolvable:$true] %s441_s22 }
  0x3e   : > { %s2603_s0 = sld [smem:[#allocation28_spill]]  ;;  %p1642_p2 = pnand %p1658_p8, %p2247_p5 }
  0x3f   : > { %s2604_s6 = sld [smem:[#allocation33_spill]]  ;;  %s496_s1 = scalar_lea.vmem [#allocation7], %s2211_s25 }
  0x40   : > { %s503_s3 = sshll.u32 %s496_s1, 4  ;;  %s2605_s12 = sld [smem:[#allocation39_spill]]  ;;  %s504_s3 = int_to_ptr.vmem [resolvable:$true] %s503_s3 }
  0x41   : > { %s547_s20 = scalar_lea.vmem [#allocation8], %s2211_s25  ;;  %s545_s8 = scalar_lea.sflag [#allocation9], %s2211_s25 }
  0x44   : > { %s437_s21 = scalar_lea.hbm %s2603_s0, %s1555_s5  ;;  %s430_s5 = scalar_lea.sflag [#allocation3], %s429_s27 }
  0x45   : > { %s439_s23 = sshll.u32 %s437_s21, 4  ;;  %s499_s17 = scalar_lea.hbm %s2604_s6, %s2032_s16  ;;  %s440_s23 = int_to_ptr.hbm [resolvable:$true] %s439_s23 }
  0x46   : > { %s501_s30 = sshll.u32 %s499_s17, 4  ;;  %s550_s15 = scalar_lea.hbm %s2605_s12, %s2032_s16  ;;  %s502_s30 = int_to_ptr.hbm [resolvable:$true] %s501_s30 }
  0x47   : > { %1644 = dma.hbm_to_vmem [thread:$0]  (!%p1642_p2), %s440_s23, 128, %s442_s22, %s430_s5  }
  0x48   : > { %1650 = dma.hbm_to_vmem [thread:$0]  (!%p2220_p9), %s502_s30, 16, %s504_s3, %s2226_s11  }
  0x49   : > { %s554_s0 = sshll.u32 %s547_s20, 4  ;;  %s552_s28 = sshll.u32 %s550_s15, 4  ;;  %s555_s0 = int_to_ptr.vmem [resolvable:$true] %s554_s0  ;;  %s553_s28 = int_to_ptr.hbm [resolvable:$true] %s552_s28 }
  0x4a   : > { %1653 = dma.hbm_to_vmem [thread:$0]  (!%p2220_p9), %s553_s28, 16, %s555_s0, %s545_s8  }
  0x4b   : > { %563 = sbr.rel (%p2231_p12) target bundleno = 2388 (0x954), region = 72  ;;  %s2301_s27 = sand.u32 (!%p2231_p12), 1, %s2016_s29  }
  0x4c   : > { %s2565_s30 = sshll.u32 (!%p2231_p12), %s2301_s27, 3  ;;  %s566_s17 = scalar_lea.sflag (!%p2231_p12), [#allocation3], %s2301_s27 }
  0x4d   : > { %s569_s11 = scalar_lea.vmem (!%p2231_p12), [#allocation2], %s2565_s30 }
  0x50   : > { %1983 = dma.done.wait (%p2256_p10), %s566_s17, 128  }
  0x51   : > { %1985 = vsyncadd (%p2256_p10), %s566_s17, 4294967168  ;;  %s575_s0 = sand.u32 1, %s2178_s19   ;;  %s2313_s13 = sand.u32 1, %s2004_s26  }
  0x52   : > { %s576_s28 = scalar_lea.sflag [#allocation6], %s575_s0 }
  0x53   : > { %1987 = dma.done.wait (%p2201_p7), %s576_s28, 32  }
  0x54   : > { %1989 = vsyncadd (%p2201_p7), %s576_s28, 4294967264  ;;  %s594_s23 = scalar_lea.sflag [#allocation9], %s2313_s13 }
  0x55   : > { %1991 = dma.done.wait (%p2201_p7), %s594_s23, 16  }
  0x56   : > { %1993 = vsyncadd (%p2201_p7), %s594_s23, 4294967280  ;;  %p687_p8 = scmp.lt.s32.totalorder %s2024_s14, 1  ;;  %s2606_s7 = sld [smem:[#allocation29_spill]] }
  0x57   : > { %s2607_s8 = sld [smem:[#allocation31_spill]]  ;;  %p1567_p7 = scmp.ne.s32.totalorder %s2024_s14, 0 }
  0x58   : > { %s2329_s19 = scalar_select %p687_p8, %s2024_s14, 1 }
  0x59   : > { %s2609_s30 = sld [smem:[#allocation34_spill]] }
  0x5a   : > { %s1619_s22 = sshll.u32 %s2329_s19, 4  ;;  %s2610_s3 = sld [smem:[#allocation35_spill]] }
  0x5b   : > { %s1622_s24 = sshll.u32 %s2329_s19, 5  ;;  %s2611_s16 = sld [smem:[#allocation36_spill]] }
  0x5c   : > { %s691_s21 = scalar_lea.vmem %s2606_s7, %s1619_s22  ;;  %s2612_s29 = sld [smem:[#allocation37_spill]] }
  0x5d   : > { %s2342_s17 = scalar_lea.vmem %s2607_s8, %s1619_s22  ;;  %s2613_s9 = sld [smem:[#allocation38_spill]] }
  0x5f   : > { %s2351_s6 = scalar_lea.vmem %s2609_s30, %s1619_s22  ;;  %s2614_s30 = sshll.u32 %s2301_s27, 3 }
  0x60   : > { %s710_s12 = scalar_lea.vmem %s2610_s3, %s2329_s19  ;;  %s2373_s10 = scalar_lea.vmem [#allocation10], %s2614_s30 }
  0x61   : > { %s2361_s15 = scalar_lea.vmem %s2611_s16, %s1622_s24  ;;  %726 = sbr.rel (%p1567_p7) target bundleno = 104 (0x68), region = 92 }
  0x62   : > { %s718_s0 = scalar_lea.vmem %s2612_s29, %s2329_s19 }
  0x63   : > { %s721_s25 = scalar_lea.vmem %s2613_s9, %s2329_s19 }
  0x66   : > { %v727_v0 = vld [vmem:[%s569_s11] sm:$0xff]  ;;  %vm728_vm0 = vcmask 261120  }
  0x67   : > { %729 = vst.msk [vmem:[%s2373_s10] sm:$0xff] %vm728_vm0, %v727_v0 }
  0x68 PF: > { %v1624_v1 = vld [vmem:[%s691_s21 + $0x8] sm:$0xff]  ;;  %v1623_v2 = vld [vmem:[%s691_s21] sm:$0xff]  ;;  %vm752_vm1 = vcmask 261120   ;;  %s2615_s29 = scalar_lea.vmem [#allocation5], %s2313_s13  ;;  %s2042_s14 = smov 88   ;;  %vm779_vm2 = vcmask 64512  }
  0x69   : > { %762 = vmatpush.bf16.msra.mxu0 %v1624_v1  ;;  %v1760_v5 = vld [vmem:[%s2615_s29] ss:$0 sm:$0xff]  ;;  %s2043_s16 = smov 96   ;;  %s2044_s11 = smov 120   ;;  %vm829_vm3 = vcmask 1043456  }
  0x6a   : > { %s2045_s9 = smov 80   ;;  %s2046_s22 = smov 72   ;;  %v769_v17 = vld [vmem:[%s2342_s17] sm:$0xf] }
  0x6b   : > { %s2047_s3 = smov 112   ;;  %v940_v20 = vsel %vm829_vm3, %v769_v17, 0  ;;  %s2048_s21 = smov 56  }
  0x6c   : > { %s2049_s2 = smov 64   ;;  %s2050_s1 = smov 104  }
  0x6d   : > { %763 = vmatpush.bf16.msra.mxu0 %v1623_v2  ;;  %s2051_s24 = smov 48   ;;  %s2052_s5 = smov 40  }
  0x6e   : > { %v2378_v3 = vld [vmem:[%s2373_s10] sm:$0xff]  ;;  %s2616_s8 = scalar_lea.vmem %s2545_s4, %s2329_s19  ;;  %s2617_s28 = sld [smem:[#allocation32_spill]] }
  0x6f   : > { %v731_v4 = vpack.c.bf16 %v2378_v3, %v2378_v3  ;;  %s2619_s30 = scalar_lea.vmem [#allocation7], %s2313_s13  ;;  %s2626_s20 = scalar_lea.vmem [#allocation8], %s2313_s13 }
  0x71   : > { %1576 = vmatmul.msk.bf16.vlgmr.msra.gmra.mxu0 %vm752_vm1, %v731_v4 }
  0x74   : > { %s2618_s23 = scalar_lea.vmem %s2617_s28, %s2329_s19 }
  0xee   : > { %v765_v6 = vpop.f32.mrf.mxu0 }
  0xef   : > { %v766_v7 = vadd.f32 %v1760_v5, %v765_v6 }
  0xf1   : > { %v773_v8 = vpack.c.bf16 %v766_v7, %v766_v7 }
  0xf3   : > { %v775_v9 = vunpack.c.l.b16 %v773_v8 }
  0xf5   : > { %v2385_v10 = vpack.c.b16 %v775_v9, %v775_v9 }
  0xf6   : > { %v767_v11 = vpop.f32.mrf.mxu0 }
  0xf7   : > { %849 = vrot.lane.b32.xlu2 %v2385_v10, %s2042_s14  ;;  %777 = vrot.lane.b32.xlu0 %v2385_v10, %s2043_s16 }
  0xff   : > { %847 = vrot.lane.b32.xlu2 %v2385_v10, %s2044_s11 }
 0x107   : > { %957 = vrot.lane.b32.xlu2 %v2385_v10, %s2045_s9 }
 0x10f   : > { %1047 = vrot.lane.b32.xlu2 %v2385_v10, %s2046_s22 }
 0x117   : > { %955 = vrot.lane.b32.xlu2 %v2385_v10, %s2047_s3 }
 0x151   : > { %v850_v12 = vpop.permute.xlu2 %849 }
 0x152   : > { %v855_v13 = vsel %vm779_vm2, %v850_v12, 0 }
 0x153   : > { %864 = vmatpush.bf16.xpose.msra.mxu3 %v855_v13 }
 0x159   : > { %v848_v14 = vpop.permute.xlu2 %847 }
 0x15a   : > { %1579 = vmatmul.msk.bf16.vlgmr.msra.gmra.mxu3 %vm779_vm2, %v848_v14 }
 0x161   : > { %v958_v15 = vpop.permute.xlu2 %957 }
 0x162   : > { %v963_v16 = vsel %vm779_vm2, %v958_v15, 0 }
 0x163   : > { %972 = vmatpush.bf16.xpose.msrb.mxu3 %v963_v16  ;;  %v770_v16 = vld [vmem:[%s2342_s17 + $0x4] sm:$0xf] }
 0x164   : > { %v921_v17 = vsel %vm829_vm3, %v770_v16, 0 }
 0x165   : > { %930 = vmatpush.bf16.msrb.mxu0 %v921_v17 }
 0x169   : > { %v1048_v18 = vpop.permute.xlu2 %1047  ;;  %v778_v19 = vpop.permute.xlu0 %777 }
 0x16a   : > { %v784_v21 = vsel %vm779_vm2, %v778_v19, 0  ;;  %v1053_v23 = vsel %vm779_vm2, %v1048_v18, 0 }
 0x16b   : > { %793 = vmatpush.bf16.xpose.msra.mxu1 %v784_v21 }
 0x171   : > { %v956_v22 = vpop.permute.xlu2 %955 }
 0x172   : > { %1577 = vmatmul.msk.bf16.vlgmr.msra.gmra.mxu1 %vm779_vm2, %v773_v8  ;;  %1583 = vmatmul.msk.bf16.vlgmr.msrb.gmra.mxu3 %vm779_vm2, %v956_v22 }
 0x173   : > { %949 = vmatpush.bf16.msrb.mxu1 %v940_v20 }
 0x177   : > { %1062 = vmatpush.bf16.xpose.msra.mxu1 %v1053_v23 }
 0x1dd   : > { %v866_v24 = vpop.f32.mrf.mxu3 }
 0x1de   : > { %v870_v25 = vsel %vm779_vm2, %v866_v24, -inf }
 0x1df   : > { %871 = vmax.xlane.f32.xlu2 %v870_v25 }
 0x1e5   : > { %v868_v26 = vpop.f32.mrf.mxu3 }
 0x1ef   : > { %v795_v27 = vpop.f32.mrf.mxu1 }
 0x1f0   : > { %v799_v28 = vsel %vm779_vm2, %v795_v27, -inf }
 0x1f1   : > { %800 = vmax.xlane.f32.xlu0 %v799_v28 }
 0x1f5   : > { %v974_v29 = vpop.f32.mrf.mxu3 }
 0x1f6   : > { %v978_v31 = vsel %vm779_vm2, %v974_v29, -inf }
 0x1f7   : > { %895 = vrot.lane.b32.xlu2 %v2385_v10, %s2048_s21  ;;  %v797_v30 = vpop.f32.mrf.mxu1 }
 0x1f9   : > { %979 = vmax.xlane.f32.xlu0 %v978_v31 }
 0x1fd   : > { %v976_v32 = vpop.f32.mrf.mxu3 }
 0x252   : > { %v872_v33 = vpop.xlane.xlu2 %871 }
 0x253   : > { %v873_v34 = vsub.f32 %v866_v24, %v872_v33 }
 0x255   : > { %v874_v35 = vmul.f32 1.442695, %v873_v34 }
 0x257   : > { %1768 = vpow2.f32 %v874_v35 }
 0x25a   : > { %v896_v63 = vpop.permute.xlu2 %895 }
 0x25b   : > { %v901_v5 = vsel %vm829_vm3, %v896_v63, 0 }
 0x25d   : > { %v2406_v36 = vpop.eup %1768 }
 0x25e   : > { %v876_v37 = vsel %vm779_vm2, %v2406_v36, 0.0 }
 0x25f   : > { %877 = vadd.xlane.f32.xlu0 %v876_v37 }
 0x264   : > { %v801_v38 = vpop.xlane.xlu0 %800 }
 0x265   : > { %v802_v39 = vsub.f32 %v795_v27, %v801_v38 }
 0x267   : > { %v803_v40 = vmul.f32 1.442695, %v802_v39 }
 0x269   : > { %1770 = vpow2.f32 %v803_v40 }
 0x26c   : > { %v980_v41 = vpop.xlane.xlu0 %979 }
 0x26d   : > { %v981_v42 = vsub.f32 %v974_v29, %v980_v41 }
 0x26f   : > { %v1771_v43 = vpop.eup %1770  ;;  %v982_v44 = vmul.f32 1.442695, %v981_v42 }
 0x270   : > { %v805_v45 = vsel %vm779_vm2, %v1771_v43, 0.0 }
 0x271   : > { %1772 = vpow2.f32 %v982_v44  ;;  %806 = vadd.xlane.f32.xlu1 %v805_v45 }
 0x277   : > { %v2411_v46 = vpop.eup %1772 }
 0x278   : > { %v984_v47 = vsel %vm779_vm2, %v2411_v46, 0.0 }
 0x279   : > { %985 = vadd.xlane.f32.xlu0 %v984_v47 }
 0x28a   : > { %824 = vrot.lane.b32.xlu1 %v2385_v10, %s2049_s2 }
 0x292   : > { %1045 = vrot.lane.b32.xlu1 %v2385_v10, %s2050_s1 }
 0x2d2   : > { %v878_v49 = vpop.xlane.xlu0 %877 }
 0x2d3   : > { %v890_v8 = vand.u32 2147483648, %v878_v49  ;;  %vm884_vm9 = vweird.f32 %v878_v49  ;;  %v888_v9 = vand.u32 2147483647, %v878_v49 }
 0x2d5   : > { %v891_v12 = vor.u32 1.1754944e-38, %v890_v8  ;;  %vm889_vm11 = vcmp.eq.f32.partialorder %v888_v9, 8.507059e+37  ;;  %v772_v9 = vld [vmem:[%s2342_s17 + $0xc] sm:$0xf] }
 0x2e4   : > { %v807_v48 = vpop.xlane.xlu1 %806 }
 0x2e5   : > { %1774 = vrcp.f32 %v807_v48  ;;  %v819_v55 = vand.u32 2147483648, %v807_v48  ;;  %vm813_vm5 = vweird.f32 %v807_v48  ;;  %v817_v57 = vand.u32 2147483647, %v807_v48 }
 0x2e6   : > { %1776 = vrcp.f32 %v878_v49 }
 0x2e7   : > { %v820_v60 = vor.u32 1.1754944e-38, %v819_v55  ;;  %vm818_vm7 = vcmp.eq.f32.partialorder %v817_v57, 8.507059e+37 }
 0x2eb   : > { %v1775_v50 = vpop.eup %1774 }
 0x2ec   : > { %v809_v51 = vmul.f32 %v1775_v50, %v807_v48  ;;  %vm814_vm4 = vweird.f32 %v1775_v50  ;;  %v1777_v54 = vpop.eup %1776  ;;  %v986_v33 = vpop.xlane.xlu0 %985 }
 0x2ed   : > { %vm815_vm6 = vmor %vm813_vm5, %vm814_vm4  ;;  %v880_v58 = vmul.f32 %v1777_v54, %v878_v49  ;;  %vm885_vm8 = vweird.f32 %v1777_v54  ;;  %1778 = vrcp.f32 %v986_v33  ;;  %v998_v44 = vand.u32 2147483648, %v986_v33 }
 0x2ee   : > { %v810_v52 = vsub.f32 1.0, %v809_v51  ;;  %vm886_vm10 = vmor %vm884_vm9, %vm885_vm8  ;;  %vm992_vm13 = vweird.f32 %v986_v33  ;;  %v996_v45 = vand.u32 2147483647, %v986_v33  ;;  %vm1255_vm9 = vcmask 523264  }
 0x2ef   : > { %v881_v62 = vsub.f32 1.0, %v880_v58  ;;  %v999_v48 = vor.u32 1.1754944e-38, %v998_v44 }
 0x2f0   : > { %v811_v53 = vmul.f32 %v1775_v50, %v810_v52  ;;  %vm997_vm15 = vcmp.eq.f32.partialorder %v996_v45, 8.507059e+37 }
 0x2f1   : > { %v882_v2 = vmul.f32 %v1777_v54, %v881_v62 }
 0x2f2   : > { %v812_v56 = vadd.f32 %v1775_v50, %v811_v53 }
 0x2f3   : > { %v883_v7 = vadd.f32 %v1777_v54, %v882_v2  ;;  %v1779_v34 = vpop.eup %1778 }
 0x2f4   : > { %v816_v59 = vsel %vm815_vm6, %v1775_v50, %v812_v56  ;;  %vm993_vm12 = vweird.f32 %v1779_v34 }
 0x2f5   : > { %v821_v61 = vsel %vm818_vm7, %v820_v60, %v816_v59  ;;  %v887_v11 = vsel %vm886_vm10, %v1777_v54, %v883_v7  ;;  %vm994_vm14 = vmor %vm992_vm13, %vm993_vm12  ;;  %v771_v54 = vld [vmem:[%s2342_s17 + $0x8] sm:$0xf]  ;;  %s1307_s17 = scalar_lea.sflag [#allocation4], %s2301_s27 }
 0x2f6   : > { %v822_v0 = vmul.f32 %v1771_v43, %v821_v61  ;;  %v892_v13 = vsel %vm889_vm11, %v891_v12, %v887_v11  ;;  %v1029_v55 = vsel %vm829_vm3, %v771_v54, 0  ;;  %v1119_v11 = vsel %vm829_vm3, %v772_v9, 0 }
 0x2f7   : > { %v893_v14 = vmul.f32 %v2406_v36, %v892_v13  ;;  %v988_v36 = vmul.f32 %v1779_v34, %v986_v33  ;;  %1038 = vmatpush.bf16.msra.mxu0 %v1029_v55 }
 0x2f8   : > { %v823_v6 = vpack.c.bf16 %v822_v0, %v822_v0 }
 0x2f9   : > { %v894_v15 = vpack.c.bf16 %v893_v14, %v893_v14  ;;  %v989_v39 = vsub.f32 1.0, %v988_v36  ;;  %v1626_v36 = vld [vmem:[%s2351_s6 + $0x8] sm:$0xff] }
 0x2fb   : > { %v990_v40 = vmul.f32 %v1779_v34, %v989_v39 }
 0x2fc   : > { %v825_v1 = vpop.permute.xlu1 %824 }
 0x2fd   : > { %v831_v4 = vsel %vm829_vm3, %v825_v1, 0  ;;  %v991_v43 = vadd.f32 %v1779_v34, %v990_v40 }
 0x2fe   : > { %840 = vmatpush.bf16.msra.mxu2 %v831_v4 }
 0x2ff   : > { %v995_v47 = vsel %vm994_vm14, %v1779_v34, %v991_v43 }
 0x300   : > { %v1000_v49 = vsel %vm997_vm15, %v999_v48, %v995_v47 }
 0x301   : > { %1578 = vmatmul.msk.bf16.vlgmr.msra.gmra.mxu2 %vm779_vm2, %v823_v6  ;;  %v1001_v50 = vmul.f32 %v2411_v46, %v1000_v49 }
 0x302   : > { %910 = vmatpush.bf16.msrb.mxu2 %v901_v5 }
 0x303   : > { %v1002_v53 = vpack.c.bf16 %v1001_v50, %v1001_v50  ;;  %v1762_v50 = vld [vmem:[%s2618_s23] ss:$0 sm:$0xff] }
 0x304   : > { %v1046_v23 = vpop.permute.xlu1 %1045 }
 0x311   : > { %1580 = vmatmul.msk.bf16.vlgmr.msrb.gmra.mxu2 %vm779_vm2, %v894_v15 }
 0x384   : > { %v842_v18 = vpop.f32.mrf.mxu2 }
 0x385   : > { %v846_v19 = vpack.c.bf16 %v842_v18, %v842_v18  ;;  %v1761_v18 = vld [vmem:[%s2616_s8] ss:$0 sm:$0xff]  ;;  %s1319_s8 = sshll.u32 %s2373_s10, 4  ;;  %s1320_s8 = int_to_ptr.vmem [resolvable:$true] %s1319_s8 }
 0x387   : > { %1582 = vmatmul.msk.bf16.vlgmr.msrb.gmra.mxu1 %vm779_vm2, %v846_v19 }
 0x38c   : > { %v844_v20 = vpop.f32.mrf.mxu2 }
 0x394   : > { %v912_v21 = vpop.f32.mrf.mxu2 }
 0x395   : > { %v916_v22 = vpack.c.bf16 %v912_v21, %v912_v21 }
 0x397   : > { %1581 = vmatmul.msk.bf16.vlgmr.msrb.gmra.mxu0 %vm779_vm2, %v916_v22  ;;  %1586 = vmatmul.msk.bf16.vlgmr.msra.gmra.mxu1 %vm779_vm2, %v1046_v23 }
 0x398   : > { %1210 = vmatpush.bf16.msrb.mxu0 %v1626_v36 }
 0x39c   : > { %v914_v24 = vpop.f32.mrf.mxu2 }
 0x404   : > { %v951_v25 = vpop.f32.mrf.mxu1 }
 0x40c   : > { %v953_v26 = vpop.f32.mrf.mxu1 }
 0x414   : > { %v932_v27 = vpop.f32.mrf.mxu0  ;;  %v1064_v28 = vpop.f32.mrf.mxu1 }
 0x415   : > { %v2427_v29 = vadd.f32 %v951_v25, %v932_v27  ;;  %v1068_v30 = vsel %vm779_vm2, %v1064_v28, -inf  ;;  %v2053_v25 = vmov 32.0  }
 0x416   : > { %1069 = vmax.xlane.f32.xlu1 %v1068_v30 }
 0x41c   : > { %v934_v31 = vpop.f32.mrf.mxu0  ;;  %v1066_v32 = vpop.f32.mrf.mxu1 }
 0x42f   : > { %1003 = vrot.lane.b32.xlu1 %v2385_v10, %s2051_s24  ;;  %s2624_s24 = sld [smem:[#allocation40_spill]] }
 0x435   : > { %s1930_s13 = scalar_lea.hbm %s2624_s24, 16 }
 0x489   : > { %v1070_v35 = vpop.xlane.xlu1 %1069 }
 0x48a   : > { %v1071_v37 = vsub.f32 %v1064_v28, %v1070_v35 }
 0x48c   : > { %v1072_v38 = vmul.f32 1.442695, %v1071_v37  ;;  %v1625_v37 = vld [vmem:[%s2351_s6] sm:$0xff] }
 0x48d   : > { %1211 = vmatpush.bf16.msrb.mxu0 %v1625_v37 }
 0x48e   : > { %1780 = vpow2.f32 %v1072_v38  ;;  %v1630_v38 = vld [vmem:[%s2361_s15 + $0x18] sm:$0xff] }
 0x48f   : > { %1263 = vmatpush.bf16.msrb.mxu1 %v1630_v38 }
 0x494   : > { %v1781_v41 = vpop.eup %1780 }
 0x495   : > { %v1074_v42 = vsel %vm779_vm2, %v1781_v41, 0.0 }
 0x496   : > { %1075 = vadd.xlane.f32.xlu0 %v1074_v42 }
 0x4a1   : > { %v1004_v51 = vpop.permute.xlu1 %1003 }
 0x4a2   : > { %v1009_v52 = vsel %vm829_vm3, %v1004_v51, 0 }
 0x4a3   : > { %1018 = vmatpush.bf16.msra.mxu2 %v1009_v52  ;;  %v1763_v52 = vld [vmem:[%s2619_s30] ss:$0 sm:$0xff] }
 0x4a6   : > { %1584 = vmatmul.msk.bf16.vlgmr.msra.gmra.mxu2 %vm779_vm2, %v1002_v53 }
 0x4a7   : > { %1128 = vmatpush.bf16.msrb.mxu2 %v1119_v11 }
 0x4aa   : > { %1093 = vrot.lane.b32.xlu0 %v2385_v10, %s2052_s5 }
 0x509   : > { %v1076_v56 = vpop.xlane.xlu0 %1075 }
 0x50a   : > { %1782 = vrcp.f32 %v1076_v56  ;;  %v1088_v46 = vand.u32 2147483648, %v1076_v56  ;;  %v1086_v61 = vand.u32 2147483647, %v1076_v56  ;;  %vm1082_vm4 = vweird.f32 %v1076_v56 }
 0x50b   : > { %1784 = vrcp.f32 %v2053_v25 }
 0x50c   : > { %v1089_v63 = vor.u32 1.1754944e-38, %v1088_v46  ;;  %vm1087_vm6 = vcmp.eq.f32.partialorder %v1086_v61, 8.507059e+37 }
 0x510   : > { %v1783_v57 = vpop.eup %1782 }
 0x511   : > { %v1078_v58 = vmul.f32 %v1783_v57, %v1076_v56  ;;  %vm1083_vm0 = vweird.f32 %v1783_v57  ;;  %v1785_v26 = vpop.eup %1784 }
 0x512   : > { %vm1084_vm5 = vmor %vm1082_vm4, %vm1083_vm0  ;;  %v1147_v27 = vmul.f32 32.0, %v1785_v26 }
 0x513   : > { %v1079_v59 = vsub.f32 1.0, %v1078_v58  ;;  %v1627_v58 = vld [vmem:[%s2361_s15] sm:$0xff] }
 0x514   : > { %v1148_v28 = vsub.f32 1.0, %v1147_v27 }
 0x515   : > { %v1080_v60 = vmul.f32 %v1783_v57, %v1079_v59  ;;  %v1764_v59 = vld [vmem:[%s710_s12] ss:$0 sm:$0xff]  ;;  %s2622_s12 = sld [smem:[#allocation19_spill]] }
 0x517   : > { %v1081_v62 = vadd.f32 %v1783_v57, %v1080_v60 }
 0x519   : > { %v1085_v0 = vsel %vm1084_vm5, %v1783_v57, %v1081_v62  ;;  %v1628_v57 = vld [vmem:[%s2361_s15 + $0x8] sm:$0xff] }
 0x51a   : > { %v1090_v10 = vsel %vm1087_vm6, %v1089_v63, %v1085_v0  ;;  %v1765_v0 = vld [vmem:[%s718_s0] ss:$0 sm:$0xff] }
 0x51b   : > { %v1091_v1 = vmul.f32 %v1781_v41, %v1090_v10  ;;  %v1629_v41 = vld [vmem:[%s2361_s15 + $0x10] sm:$0xff]  ;;  %s1616_s15 = sshll.u32 %s2622_s12, 3 }
 0x51c   : > { %v1094_v2 = vpop.permute.xlu0 %1093  ;;  %1264 = vmatpush.bf16.msrb.mxu1 %v1629_v41  ;;  %s1317_s5 = scalar_lea.hbm %s2624_s24, %s1616_s15 }
 0x51d   : > { %v1099_v4 = vsel %vm829_vm3, %v1094_v2, 0  ;;  %v1092_v5 = vpack.c.bf16 %v1091_v1, %v1091_v1  ;;  %s1321_s6 = sshll.u32 %s1317_s5, 4  ;;  %s1322_s6 = int_to_ptr.hbm [resolvable:$true] %s1321_s6 }
 0x51e   : > { %1108 = vmatpush.bf16.msra.mxu3 %v1099_v4  ;;  %s1924_s19 = sshra.s32 %s1322_s6, 4  ;;  %s1925_s19 = int_to_ptr.hbm [resolvable:$true] %s1924_s19 }
 0x51f   : > { %p1931_p4 = scmp.lt.s32.totalorder %s1925_s19, %s2624_s24 }
 0x520   : > { %1265 = vmatpush.bf16.msrb.mxu1 %v1628_v57 }
 0x521   : > { %1587 = vmatmul.msk.bf16.vlgmr.msra.gmra.mxu3 %vm779_vm2, %v1092_v5 }
 0x524   : > { %1266 = vmatpush.bf16.msrb.mxu1 %v1627_v58 }
 0x529   : > { %v1020_v6 = vpop.f32.mrf.mxu2 }
 0x52a   : > { %v1024_v7 = vpack.c.bf16 %v1020_v6, %v1020_v6 }
 0x52c   : > { %1585 = vmatmul.msk.bf16.vlgmr.msra.gmra.mxu0 %vm779_vm2, %v1024_v7 }
 0x531   : > { %v1022_v8 = vpop.f32.mrf.mxu2 }
 0x5a4   : > { %v1110_v12 = vpop.f32.mrf.mxu3 }
 0x5a5   : > { %v1114_v13 = vpack.c.bf16 %v1110_v12, %v1110_v12 }
 0x5a7   : > { %1588 = vmatmul.msk.bf16.vlgmr.msrb.gmra.mxu2 %vm779_vm2, %v1114_v13  ;;  %vm1151_vm2 = vweird.f32 %v1785_v26 }
 0x5a9   : > { %v1040_v14 = vpop.f32.mrf.mxu0 }
 0x5aa   : > { %v1044_v15 = vadd.f32 %v1040_v14, %v2427_v29  ;;  %v1149_v29 = vmul.f32 %v1785_v26, %v1148_v28 }
 0x5ac   : > { %v1112_v16 = vpop.f32.mrf.mxu3  ;;  %v1150_v30 = vadd.f32 %v1785_v26, %v1149_v29 }
 0x5ae   : > { %v1152_v31 = vsel %vm1151_vm2, %v1785_v26, %v1150_v30 }
 0x5b1   : > { %v1042_v17 = vpop.f32.mrf.mxu0 }
 0x62a   : > { %v1130_v19 = vpop.f32.mrf.mxu2 }
 0x62b   : > { %v1134_v20 = vadd.f32 %v1130_v19, %v1044_v15 }
 0x62d   : > { %v1139_v21 = vadd.f32 %v1761_v18, %v1134_v20 }
 0x62f   : > { %v1140_v22 = vadd.f32 %v1139_v21, %v2378_v3  ;;  %v1766_v21 = vld [vmem:[%s721_s25] ss:$0 sm:$0xff]  ;;  %s1926_s25 = scalar_lea.hbm %s1925_s19, 8 }
 0x630   : > { %p1927_p9 = scmp.ne.s32.totalorder %s1925_s19, %s1926_s25  ;;  %p1932_p5 = scmp.lt.s32.totalorder %s1930_s13, %s1926_s25 }
 0x631   : > { %v1143_v23 = vsel %vm752_vm1, %v1140_v22, 0.0 }
 0x632   : > { %v1132_v24 = vpop.f32.mrf.mxu2  ;;  %1144 = vadd.xlane.f32.xlu0 %v1143_v23  ;;  %p1928_p12 = pnand %p1927_p9, %p2260_p0  ;;  %p1933_p6 = por %p1932_p5, %p1931_p4 }
 0x633   : > { %v1767_v24 = vld [vmem:[%s2626_s20] ss:$0 sm:$0xff] }
 0x634   : > { %p1929_p13 = pneg %p1928_p12 }
 0x636   : > { %p1934_p10 = pnand %p1933_p6, %p1929_p13 }
 0x6a5   : > { %v1145_v32 = vpop.xlane.xlu0 %1144 }
 0x6a6   : > { %v1153_v33 = vmul.f32 %v1152_v31, %v1145_v32 }
 0x6a8   : > { %v1154_v3 = vsub.f32 %v1140_v22, %v1153_v33 }
 0x6aa   : > { %v1155_v34 = vmul.f32 %v1154_v3, %v1154_v3 }
 0x6ac   : > { %v1156_v35 = vsel %vm752_vm1, %v1155_v34, 0.0 }
 0x6ad   : > { %1157 = vadd.xlane.f32.xlu2 %v1156_v35 }
 0x720   : > { %v1158_v39 = vpop.xlane.xlu2 %1157 }
 0x721   : > { %v1159_v40 = vmul.f32 %v1158_v39, %v1152_v31 }
 0x723   : > { %v1160_v42 = vadd.f32 1e-05, %v1159_v40 }
 0x725   : > { %1786 = vrsqrt.f32 %v1160_v42  ;;  %vm1167_vm7 = vweird.f32 %v1160_v42 }
 0x72b   : > { %v1787_v43 = vpop.eup %1786 }
 0x72c   : > { %v1162_v44 = vmul.f32 %v1787_v43, %v1160_v42  ;;  %vm1168_vm3 = vweird.f32 %v1787_v43 }
 0x72d   : > { %vm1169_vm8 = vmor %vm1167_vm7, %vm1168_vm3 }
 0x72e   : > { %v1163_v45 = vmul.f32 %v1787_v43, %v1162_v44 }
 0x730   : > { %v1164_v47 = vmul.f32 0.5, %v1163_v45 }
 0x732   : > { %v1165_v48 = vsub.f32 1.5, %v1164_v47 }
 0x734   : > { %v1166_v49 = vmul.f32 %v1787_v43, %v1165_v48 }
 0x736   : > { %v1170_v51 = vsel %vm1169_vm8, %v1787_v43, %v1166_v49 }
 0x737   : > { %v1171_v53 = vmul.f32 %v1170_v51, %v1154_v3 }
 0x739   : > { %v1175_v54 = vmul.f32 %v1762_v50, %v1171_v53 }
 0x73b   : > { %v1179_v55 = vadd.f32 %v1763_v52, %v1175_v54 }
 0x73d   : > { %v1180_v56 = vpack.c.bf16 %v1179_v55, %v1179_v55 }
 0x73f   : > { %1597 = vmatmul.msk.bf16.vlgmr.msrb.gmra.mxu0 %vm752_vm1, %v1180_v56 }
 0x7bc   : > { %v1213_v46 = vpop.f32.mrf.mxu0 }
 0x7bd   : > { %v1214_v60 = vadd.f32 %v1764_v59, %v1213_v46 }
 0x7bf   : > { %v1217_v61 = vmax.f32 %v1214_v60, 0.0 }
 0x7c1   : > { %v1218_v62 = vpack.c.bf16 %v1217_v61, %v1217_v61 }
 0x7c3   : > { %1614 = vmatmul.msk.bf16.vlgmr.msrb.gmra.mxu1 %vm1255_vm9, %v1218_v62 }
 0x7c4   : > { %v1215_v63 = vpop.f32.mrf.mxu0 }
 0x840   : > { %v1268_v10 = vpop.f32.mrf.mxu1 }
 0x841   : > { %v1269_v1 = vadd.f32 %v1765_v0, %v1268_v10 }
 0x843   : > { %v1272_v2 = vadd.f32 %v1269_v1, %v1179_v55 }
 0x845   : > { %v1275_v4 = vsel %vm752_vm1, %v1272_v2, 0.0 }
 0x846   : > { %1276 = vadd.xlane.f32.xlu1 %v1275_v4 }
 0x848   : > { %v1270_v5 = vpop.f32.mrf.mxu1 }
 0x8b9   : > { %v1277_v6 = vpop.xlane.xlu1 %1276 }
 0x8ba   : > { %v1278_v7 = vmul.f32 %v1277_v6, %v1152_v31 }
 0x8bc   : > { %v1279_v8 = vsub.f32 %v1272_v2, %v1278_v7 }
 0x8be   : > { %v1280_v9 = vmul.f32 %v1279_v8, %v1279_v8 }
 0x8c0   : > { %v1281_v11 = vsel %vm752_vm1, %v1280_v9, 0.0 }
 0x8c1   : > { %1282 = vadd.xlane.f32.xlu0 %v1281_v11 }
 0x934   : > { %v1283_v12 = vpop.xlane.xlu0 %1282 }
 0x935   : > { %v1284_v13 = vmul.f32 %v1283_v12, %v1152_v31 }
 0x937   : > { %v1285_v14 = vadd.f32 1e-05, %v1284_v13 }
 0x939   : > { %1788 = vrsqrt.f32 %v1285_v14  ;;  %vm1292_vm11 = vweird.f32 %v1285_v14 }
 0x93f   : > { %v1789_v15 = vpop.eup %1788 }
 0x940   : > { %v1287_v16 = vmul.f32 %v1789_v15, %v1285_v14  ;;  %vm1293_vm10 = vweird.f32 %v1789_v15 }
 0x941   : > { %vm1294_vm12 = vmor %vm1292_vm11, %vm1293_vm10 }
 0x942   : > { %v1288_v17 = vmul.f32 %v1789_v15, %v1287_v16 }
 0x944   : > { %v1289_v18 = vmul.f32 0.5, %v1288_v17 }
 0x946   : > { %v1290_v19 = vsub.f32 1.5, %v1289_v18 }
 0x948   : > { %v1291_v20 = vmul.f32 %v1789_v15, %v1290_v19 }
 0x94a   : > { %v1295_v22 = vsel %vm1294_vm12, %v1789_v15, %v1291_v20 }
 0x94b   : > { %v1296_v23 = vmul.f32 %v1295_v22, %v1279_v8 }
 0x94d   : > { %v1300_v25 = vmul.f32 %v1766_v21, %v1296_v23 }
 0x94f   : > { %v1304_v26 = vadd.f32 %v1767_v24, %v1300_v25 }
 0x951   : > { %1305 = vst.msk [vmem:[%s2373_s10] sm:$0xff] %vm752_vm1, %v1304_v26 }
 0x952   : > { %1937 = shalt.err (!%p1934_p10)
}
 0x953   : > { %1639 = dma.vmem_to_hbm [thread:$0]  (%p2260_p0), %s1320_s8, 128, %s1322_s6, %s1307_s17  }
 0x954 PF: > { %s2627_s27 = sld [smem:[#allocation16_spill]]  ;;  %p1659_p1 = scmp.ge.s32.totalorder %s2040_s18, 2 }
 0x956   : > { %p1655_p11 = pnand %p1659_p1, %p2267_p3 }
 0x958   : > { %p1656_p2 = pneg %p1655_p11 }
 0x95a   : > { %s1333_s14 = sand.u32 1, %s2627_s27  }
 0x95b   : > { %s1334_s16 = scalar_lea.sflag [#allocation4], %s1333_s14 }
 0x95c   : > { %1995 = dma.done.wait (%p1656_p2), %s1334_s16, 128  }
 0x95d   : > { %1997 = vsyncadd (%p1656_p2), %s1334_s16, 4294967168  ;;  %s35_s18 = sadd.s32 1, %s2040_s18   ;;  %s2629_s11 = sld [smem:[#allocation15_spill]] }
 0x95e   : > { %p32_p8 = scmp.ge.s32.totalorder %s35_s18, 6   ;;  %s2630_s27 = sld [smem:[#allocation23_spill]] }
 0x95f   : > { %s2631_s28 = sld [smem:[#allocation17_spill]]  ;;  %s2638_s25 = smov %s2004_s26 }
 0x960   : > { %s2632_s29 = sld [smem:[#allocation18_spill]] }
 0x961   : > { %s2633_s30 = sld [smem:[#allocation27_spill]]  ;;  %34 = sbr.rel (!%p32_p8) target bundleno = 27 (0x1b), region = 185 }
 0x962   : > { %s2634_s14 = sld [smem:[#allocation20_spill]] }
 0x963   : > { %s2635_s15 = sld [smem:[#allocation21_spill]]  ;;  %s2639_s26 = smov %s2629_s11 }
 0x964   : > { %s2636_s16 = sld [smem:[#allocation22_spill]] }
 0x965   : > { %s2637_s17 = sld [smem:[#allocation24_spill]] }
 0x966   :  { %1340 = vsyncpa [#allocation3], 1 }
 0x967   :  { %1342 = vsyncpa [#allocation3 + $0x1], 1 }
 0x968   :  { %1343 = vsyncpa [#allocation6], 1 }
 0x969   :  { %1345 = vsyncpa [#allocation6 + $0x1], 1 }
 0x96a   :  { %1346 = vsyncpa [#allocation9], 1 }
 0x96b   :  { %1348 = vsyncpa [#allocation9 + $0x1], 1 }
 0x96c   :  { %1349 = vsyncpa [#allocation4], 1 }
 0x96d   :  { %1351 = vsyncpa [#allocation4 + $0x1], 1 }

</bundles_post_ra>
